<compile_context>
chip_gen: v6e
topology: v6e:2x2x1
jax: 0.10.0
libtpu: 0.0.40
codegen_flags: <defaults>
</compile_context>

<pallas_src>
import functools

import jax
import jax.numpy as jnp
from jax.experimental import pallas as pl
from jax.experimental.pallas import tpu as pltpu


# ----------------------------- Pallas kernel ------------------------------


def _value_kernel(x_ref, w1_ref, b1_ref, w2_ref, b2_ref, wh_ref, out_ref):
    """Per-token value head.

    x_ref   : (TN, H)  bf16  token activations (embeddings), TN tokens/tile
    w1_ref  : (H, F)   bf16  MLP up-projection
    b1_ref  : (1, F)   f32
    w2_ref  : (F, H)   bf16  MLP down-projection
    b2_ref  : (1, H)   f32
    wh_ref  : (1, H)   f32   reward head weight (row vector)
    out_ref : (1, 1, TN) f32 per-token scalar reward, tokens on the lane axis
    """
    x = x_ref[...]                                                   # (TN, H) bf16

    # Backbone block: residual MLP with tanh-GELU (MXU matmuls, f32 accum).
    h = jnp.dot(x, w1_ref[...], preferred_element_type=jnp.float32)  # (TN, F)
    h = jax.nn.gelu(h + b1_ref[...], approximate=True)               # EUP
    h = jnp.dot(h.astype(jnp.bfloat16), w2_ref[...],
                preferred_element_type=jnp.float32)                  # (TN, H)
    h = h + b2_ref[...] + x.astype(jnp.float32)                      # residual

    # Reward head: VPU multiply + lane reduction (XLU) -> lane-dense output.
    r = jnp.sum(h * wh_ref[...], axis=-1)                            # (TN,)
    out_ref[...] = r.reshape(out_ref.shape)                          # (1, 1, TN)


def _value_head_pallas(x, w1, b1, w2, b2, wh, *, tn):
    """x: (N, H) bf16 token activations -> (N//tn, 1, tn) f32 rewards."""
    n, h = x.shape
    f = w1.shape[1]
    assert n % tn == 0
    g = n // tn

    full = lambda i: (0, 0)

    return pl.pallas_call(
        _value_kernel,
        out_shape=jax.ShapeDtypeStruct((g, 1, tn), jnp.float32),
        grid_spec=pltpu.PrefetchScalarGridSpec(
            num_scalar_prefetch=0,
            grid=(g,),
            in_specs=[
                pl.BlockSpec((tn, h), lambda i: (i, 0)),   # x: streamed over tokens
                pl.BlockSpec((h, f), full),                # w1 (resident)
                pl.BlockSpec((1, f), full),                # b1
                pl.BlockSpec((f, h), full),                # w2 (resident)
                pl.BlockSpec((1, h), full),                # b2
                pl.BlockSpec((1, h), full),                # wh
            ],
            # Lane-dense output: block == full (1, tn) in the last two dims.
            out_specs=pl.BlockSpec((1, 1, tn), lambda i: (i, 0, 0)),
        ),
        compiler_params=pltpu.CompilerParams(
            dimension_semantics=("parallel",),
            vmem_limit_bytes=48 * 1024 * 1024,
        ),
    )(x, w1, b1, w2, b2, wh)


# ------------------------------ Value module -------------------------------


def init_value_params(key, *, vocab_size, hidden, ffn):
    ks = jax.random.split(key, 6)
    scale = 0.02
    return dict(
        tok_emb=(scale * jax.random.normal(ks[0], (vocab_size, hidden),
                                           jnp.float32)).astype(jnp.bfloat16),
        w1=(scale * jax.random.normal(ks[1], (hidden, ffn),
                                      jnp.float32)).astype(jnp.bfloat16),
        b1=jnp.zeros((1, ffn), jnp.float32),
        w2=(scale * jax.random.normal(ks[2], (ffn, hidden),
                                      jnp.float32)).astype(jnp.bfloat16),
        b2=jnp.zeros((1, hidden), jnp.float32),
        wh=(scale * jax.random.normal(ks[3], (1, hidden), jnp.float32)),
        bh=jnp.zeros((), jnp.float32),
    )


@functools.partial(jax.jit, static_argnames=("tn",))
def value_forward(params, sequences, sequences_attention_mask, *, tn=256):
    """Mirrors Value.forward: returns dict(values=rewards[:, :-1]).

    sequences               : (B, S) int32 token ids
    sequences_attention_mask: (B, S) int32/float mask (1 = valid)
    """
    b, s = sequences.shape
    hidden = params["tok_emb"].shape[1]

    # Glue: embedding gather + mask, flatten to token-major (N, H) bf16.
    # TODO(synk): fuse the embedding gather into the kernel via scalar-prefetch
    # row indices (pl.Element index_map) to avoid materializing x in HBM.
    x = jnp.take(params["tok_emb"], sequences, axis=0)               # (B, S, H)
    x = x * sequences_attention_mask.astype(x.dtype)[..., None]      # mask pad
    x = x.reshape(b * s, hidden)

    # Pad token count to a multiple of the token tile (multiple of 128 lanes).
    n = b * s
    n_pad = ((n + tn - 1) // tn) * tn
    if n_pad != n:
        x = jnp.pad(x, ((0, n_pad - n), (0, 0)))

    r = _value_head_pallas(
        x, params["w1"], params["b1"], params["w2"], params["b2"],
        params["wh"], tn=tn)                                         # (G, 1, TN)

    # Lane-dense tiles flatten back to token order (tile-major == row-major).
    rewards = r.reshape(n_pad)[:n] + params["bh"]                    # (N,)
    rewards = rewards.reshape(b, s)                                  # (B, S)
    values = rewards[:, :-1]                                         # (B, S-1)
    return dict(values=values)


# ---------------------------------- main -----------------------------------

if __name__ == "__main__":
    B, S = 2, 8            # batch, sequence length
    VOCAB = 64
    HIDDEN = 128           # MXU-native lane width
    FFN = 256

    key = jax.random.PRNGKey(0)
    k_param, k_seq = jax.random.split(key)

    params = init_value_params(k_param, vocab_size=VOCAB, hidden=HIDDEN, ffn=FFN)

    sequences = jax.random.randint(k_seq, (B, S), 0, VOCAB, dtype=jnp.int32)
    # simple left-aligned attention mask (last token of second row is padding)
    sequences_attention_mask = jnp.ones((B, S), jnp.int32).at[1, -1].set(0)

    out = value_forward(params, sequences, sequences_attention_mask)
    values = jax.block_until_ready(out["values"])

    assert values.shape == (B, S - 1), values.shape
    assert values.dtype == jnp.float32
    print("KERNEL_OK")
</pallas_src>

<mosaic_0001>
module attributes {stable_mosaic.version = 11 : i64} {
  func.func @_value_kernel(%arg0: i32, %arg1: memref<256x128xbf16, #tpu.memory_space<vmem>>, %arg2: memref<128x256xbf16, #tpu.memory_space<vmem>>, %arg3: memref<1x256xf32, #tpu.memory_space<vmem>>, %arg4: memref<256x128xbf16, #tpu.memory_space<vmem>>, %arg5: memref<1x128xf32, #tpu.memory_space<vmem>>, %arg6: memref<1x128xf32, #tpu.memory_space<vmem>>, %arg7: memref<1x1x256xf32, #tpu.memory_space<vmem>>) attributes {dimension_semantics = [#tpu.dimension_semantics<parallel>], iteration_bounds = array<i64: 1>, scalar_prefetch = 0 : i64, scratch_operands = 0 : i64, tpu.core_type = #tpu.core_type<tc>, window_params = [{transform_indices = @transform_0, window_bounds = array<i64: 256, 128>}, {pipeline_mode = #tpu.pipeline_mode<synchronous>, transform_indices = @transform_1, window_bounds = array<i64: 128, 256>}, {pipeline_mode = #tpu.pipeline_mode<synchronous>, transform_indices = @transform_2, window_bounds = array<i64: 1, 256>}, {pipeline_mode = #tpu.pipeline_mode<synchronous>, transform_indices = @transform_3, window_bounds = array<i64: 256, 128>}, {pipeline_mode = #tpu.pipeline_mode<synchronous>, transform_indices = @transform_4, window_bounds = array<i64: 1, 128>}, {pipeline_mode = #tpu.pipeline_mode<synchronous>, transform_indices = @transform_5, window_bounds = array<i64: 1, 128>}, {transform_indices = @transform_6, window_bounds = array<i64: 1, 1, 256>}]} {
    %c0 = arith.constant 0 : index
    %c0_0 = arith.constant 0 : index
    %0 = vector.load %arg1[%c0, %c0_0] : memref<256x128xbf16, #tpu.memory_space<vmem>>, vector<256x128xbf16>
    %c0_1 = arith.constant 0 : index
    %c0_2 = arith.constant 0 : index
    %1 = vector.load %arg2[%c0_1, %c0_2] : memref<128x256xbf16, #tpu.memory_space<vmem>>, vector<128x256xbf16>
    %cst = arith.constant dense<0.000000e+00> : vector<256x256xf32>
    %2 = tpu.matmul %0, %1, %cst {dimension_numbers = #tpu.dot_dimension_numbers<[1], [0], [0], [1], [0, 0, 1, 1], [], []>} : vector<256x128xbf16>, vector<128x256xbf16>, vector<256x256xf32> -> vector<256x256xf32>
    %c0_3 = arith.constant 0 : index
    %c0_4 = arith.constant 0 : index
    %3 = vector.load %arg3[%c0_3, %c0_4] : memref<1x256xf32, #tpu.memory_space<vmem>>, vector<1x256xf32>
    %4 = vector.broadcast %3 : vector<1x256xf32> to vector<256x256xf32>
    %5 = arith.addf %2, %4 : vector<256x256xf32>
    %6 = arith.mulf %5, %5 : vector<256x256xf32>
    %7 = arith.mulf %5, %6 : vector<256x256xf32>
    %cst_5 = arith.constant 4.471500e-02 : f32
    %8 = vector.broadcast %cst_5 : f32 to vector<256x256xf32>
    %9 = arith.mulf %8, %7 : vector<256x256xf32>
    %10 = arith.addf %5, %9 : vector<256x256xf32>
    %cst_6 = arith.constant 0.797884583 : f32
    %11 = vector.broadcast %cst_6 : f32 to vector<256x256xf32>
    %12 = arith.mulf %11, %10 : vector<256x256xf32>
    %13 = math.tanh %12 : vector<256x256xf32>
    %cst_7 = arith.constant 1.000000e+00 : f32
    %14 = vector.broadcast %cst_7 : f32 to vector<256x256xf32>
    %15 = arith.addf %14, %13 : vector<256x256xf32>
    %cst_8 = arith.constant 5.000000e-01 : f32
    %16 = vector.broadcast %cst_8 : f32 to vector<256x256xf32>
    %17 = arith.mulf %16, %15 : vector<256x256xf32>
    %18 = arith.mulf %5, %17 : vector<256x256xf32>
    %19 = arith.truncf %18 : vector<256x256xf32> to vector<256x256xbf16>
    %c0_9 = arith.constant 0 : index
    %c0_10 = arith.constant 0 : index
    %20 = vector.load %arg4[%c0_9, %c0_10] : memref<256x128xbf16, #tpu.memory_space<vmem>>, vector<256x128xbf16>
    %cst_11 = arith.constant dense<0.000000e+00> : vector<256x128xf32>
    %21 = tpu.matmul %19, %20, %cst_11 {dimension_numbers = #tpu.dot_dimension_numbers<[1], [0], [0], [1], [0, 0, 1, 1], [], []>} : vector<256x256xbf16>, vector<256x128xbf16>, vector<256x128xf32> -> vector<256x128xf32>
    %c0_12 = arith.constant 0 : index
    %c0_13 = arith.constant 0 : index
    %22 = vector.load %arg5[%c0_12, %c0_13] : memref<1x128xf32, #tpu.memory_space<vmem>>, vector<1x128xf32>
    %23 = vector.broadcast %22 : vector<1x128xf32> to vector<256x128xf32>
    %24 = arith.addf %21, %23 : vector<256x128xf32>
    %25 = arith.extf %0 : vector<256x128xbf16> to vector<256x128xf32>
    %26 = arith.addf %24, %25 : vector<256x128xf32>
    %c0_14 = arith.constant 0 : index
    %c0_15 = arith.constant 0 : index
    %27 = vector.load %arg6[%c0_14, %c0_15] : memref<1x128xf32, #tpu.memory_space<vmem>>, vector<1x128xf32>
    %28 = vector.broadcast %27 : vector<1x128xf32> to vector<256x128xf32>
    %29 = arith.mulf %26, %28 : vector<256x128xf32>
    %cst_16 = arith.constant dense<0.000000e+00> : vector<256xf32>
    %30 = vector.multi_reduction <add>, %29, %cst_16 [1] : vector<256x128xf32> to vector<256xf32>
    %31 = vector.shape_cast %30 : vector<256xf32> to vector<1x1x256xf32>
    %c0_17 = arith.constant 0 : index
    %c0_18 = arith.constant 0 : index
    %c0_19 = arith.constant 0 : index
    %32 = vector.load %arg7[%c0_17, %c0_18, %c0_19] : memref<1x1x256xf32, #tpu.memory_space<vmem>>, vector<1x1x256xf32>
    tpu.vector_store %arg7[%c0_17, %c0_18, %c0_19], %31 {strides = array<i32>} : memref<1x1x256xf32, #tpu.memory_space<vmem>>, vector<1x1x256xf32>,
    return
  }
  func.func @transform_0(%arg0: i32) -> (i32, i32) {
    %c0_i32 = arith.constant 0 : i32
    %c0_i32_0 = arith.constant 0 : i32
    return %arg0, %c0_i32 : i32, i32
  }
  func.func @transform_1(%arg0: i32) -> (i32, i32) {
    %c0_i32 = arith.constant 0 : i32
    %c0_i32_0 = arith.constant 0 : i32
    %c0_i32_1 = arith.constant 0 : i32
    return %c0_i32, %c0_i32_0 : i32, i32
  }
  func.func @transform_2(%arg0: i32) -> (i32, i32) {
    %c0_i32 = arith.constant 0 : i32
    %c0_i32_0 = arith.constant 0 : i32
    %c0_i32_1 = arith.constant 0 : i32
    return %c0_i32, %c0_i32_0 : i32, i32
  }
  func.func @transform_3(%arg0: i32) -> (i32, i32) {
    %c0_i32 = arith.constant 0 : i32
    %c0_i32_0 = arith.constant 0 : i32
    %c0_i32_1 = arith.constant 0 : i32
    return %c0_i32, %c0_i32_0 : i32, i32
  }
  func.func @transform_4(%arg0: i32) -> (i32, i32) {
    %c0_i32 = arith.constant 0 : i32
    %c0_i32_0 = arith.constant 0 : i32
    %c0_i32_1 = arith.constant 0 : i32
    return %c0_i32, %c0_i32_0 : i32, i32
  }
  func.func @transform_5(%arg0: i32) -> (i32, i32) {
    %c0_i32 = arith.constant 0 : i32
    %c0_i32_0 = arith.constant 0 : i32
    %c0_i32_1 = arith.constant 0 : i32
    return %c0_i32, %c0_i32_0 : i32, i32
  }
  func.func @transform_6(%arg0: i32) -> (i32, i32, i32) {
    %c0_i32 = arith.constant 0 : i32
    %c0_i32_0 = arith.constant 0 : i32
    %c0_i32_1 = arith.constant 0 : i32
    return %arg0, %c0_i32, %c0_i32_0 : i32, i32, i32
  }
}

</mosaic_0001>

<bundles_post_ra>
// kernel: value_forward.1
= control target key start
LH: loop header
LB: loop body
LE: loop exit
PB: predicated region body
PF: predicated region fallthrough
CT: control target
= control target key end

     0   :  { %11 = vsyncpa [#allocation3], 0  ;;  %s6610_s0 = inlined_call_operand.vmem [shape: bf16[256,128], index: 0, kind: input, shape index: {}]   ;;  %s6611_s1 = inlined_call_operand.vmem [shape: bf16[128,256], index: 1, kind: input, shape index: {}]   ;;  %s6612_s2 = inlined_call_operand.vmem [shape: f32[1,256], index: 2, kind: input, shape index: {}]   ;;  %s6613_s3 = inlined_call_operand.vmem [shape: bf16[256,128], index: 3, kind: input, shape index: {}]   ;;  %s6614_s4 = inlined_call_operand.hbm [shape: f32[1,128], index: 4, kind: input, shape index: {}]   ;;  %s6615_s5 = inlined_call_operand.hbm [shape: f32[1,128], index: 5, kind: input, shape index: {}]   ;;  %s6616_s6 = inlined_call_operand.vmem [shape: f32[1,1,256], index: 6, kind: output, shape index: {}]  }
   0x1   :  { %12 = vsyncpa [#allocation5], 0  ;;  %s4913_s21 = smov [#allocation2]   ;;  %s4914_s23 = smov [#allocation4]  }
   0x2   :  { %s27_s22 = sshll.u32 %s4913_s21, 4  ;;  %s37_s24 = sshll.u32 %s4914_s23, 4  ;;  %s28_s22 = int_to_ptr.vmem [resolvable:$true] %s27_s22  ;;  %s38_s24 = int_to_ptr.vmem [resolvable:$true] %s37_s24 }
   0x3   :  { %s4877_s25 = scalar_lea.vmem %s28_s22, 16  ;;  %s4881_s26 = scalar_lea.vmem %s28_s22, 32 }
   0x4   :  { %p4878_p0 = scmp.ne.s32.totalorder %s28_s22, %s4877_s25  ;;  %p4882_p1 = scmp.lt.s32.totalorder %s28_s22, %s28_s22 }
   0x5   :  { %p4883_p2 = scmp.lt.s32.totalorder %s4881_s26, %s4877_s25 }
   0x7   :  { %p4884_p3 = por %p4883_p2, %p4882_p1 }
   0x9   :  { %p4885_p4 = pnand %p4884_p3, %p4878_p0 }
   0xb   :  { %4888 = shalt.err (!%p4885_p4)
}
   0xc   :  { %30 = dma.hbm_to_vmem [thread:$0]  %s6614_s4, 16, %s28_s22, [#allocation3]  }
   0xd   :  { %s4897_s29 = scalar_lea.vmem %s38_s24, 16  ;;  %s4901_s30 = scalar_lea.vmem %s38_s24, 32 }
   0xe   :  { %p4898_p5 = scmp.ne.s32.totalorder %s38_s24, %s4897_s29  ;;  %p4902_p6 = scmp.lt.s32.totalorder %s38_s24, %s38_s24 }
   0xf   :  { %p4903_p7 = scmp.lt.s32.totalorder %s4901_s30, %s4897_s29 }
  0x11   :  { %p4904_p8 = por %p4903_p7, %p4902_p6 }
  0x13   :  { %p4905_p9 = pnand %p4904_p8, %p4898_p5 }
  0x15   :  { %4908 = shalt.err (!%p4905_p9)
}
  0x16   :  { %40 = dma.hbm_to_vmem [thread:$0]  %s6615_s5, 16, %s38_s24, [#allocation5]  }
  0x17   :  { %4909 = dma.done.wait [#allocation3], 16  }
  0x18   :  { %4910 = vsyncadd [#allocation3], 4294967280 }
  0x19   :  { %4911 = dma.done.wait [#allocation5], 16  }
  0x1a   :  { %4912 = vsyncadd [#allocation5], 4294967280  ;;  %v4915_v0 = vmov 0   ;;  %v4653_v1 = vld [vmem:[%s6611_s1 + $0x74] ss:$8 sps:$4 sm:$0xff]   ;;  %v48_v17 = vld [vmem:[%s6610_s0] sm:$0xff]   ;;  %v98_v49 = vlaneseq }
  0x1b   :  { %316 = vmatprep.mubr.bf16.mxu0 %v4915_v0  ;;  %4651 = vset.pattern.permute.xlu0 %v4915_v0  ;;  %v4655_v2 = vld [vmem:[%s6611_s1 + $0x70] ss:$8 sps:$4 sm:$0xff]   ;;  %v4656_v3 = vld [vmem:[%s6611_s1 + $0x64] ss:$8 sps:$4 sm:$0xff]   ;;  %v4658_v4 = vld [vmem:[%s6611_s1 + $0x60] ss:$8 sps:$4 sm:$0xff]  }
  0x1c   :  { %4652 = vset.pattern.permute.xlu1 %v4915_v0  ;;  %284 = vmatprep.subr.bf16.mxu0 %v4653_v1  ;;  %v4659_v5 = vld [vmem:[%s6611_s1 + $0x54] ss:$8 sps:$4 sm:$0xff]   ;;  %v4661_v6 = vld [vmem:[%s6611_s1 + $0x50] ss:$8 sps:$4 sm:$0xff]   ;;  %v4662_v7 = vld [vmem:[%s6611_s1 + $0x44] ss:$8 sps:$4 sm:$0xff]  }
  0x1d   :  { %285 = vmatpush1.bf16.msra.mxu0 %v4655_v2  ;;  %v4664_v8 = vld [vmem:[%s6611_s1 + $0x40] ss:$8 sps:$4 sm:$0xff]   ;;  %v4665_v9 = vld [vmem:[%s6611_s1 + $0x34] ss:$8 sps:$4 sm:$0xff]   ;;  %v4667_v10 = vld [vmem:[%s6611_s1 + $0x30] ss:$8 sps:$4 sm:$0xff]  }
  0x1e   :  { %286 = vmatprep.subr.bf16.mxu0 %v4656_v3  ;;  %v4668_v11 = vld [vmem:[%s6611_s1 + $0x24] ss:$8 sps:$4 sm:$0xff]   ;;  %v4670_v12 = vld [vmem:[%s6611_s1 + $0x20] ss:$8 sps:$4 sm:$0xff]   ;;  %v4671_v13 = vld [vmem:[%s6611_s1 + $0x14] ss:$8 sps:$4 sm:$0xff]  }
  0x1f   :  { %v4673_v14 = vld [vmem:[%s6611_s1 + $0x10] ss:$8 sps:$4 sm:$0xff]   ;;  %v4674_v15 = vld [vmem:[%s6611_s1 + $0x4] ss:$8 sps:$4 sm:$0xff]   ;;  %v4676_v16 = vld [vmem:[%s6611_s1] ss:$8 sps:$4 sm:$0xff]  }
  0x20   :  { %v50_v18 = vld [vmem:[%s6610_s0 + $0x8] sm:$0xff]   ;;  %v52_v19 = vld [vmem:[%s6610_s0 + $0x10] sm:$0xff]   ;;  %v54_v20 = vld [vmem:[%s6610_s0 + $0x18] sm:$0xff]   ;;  %v5121_v50 = vshrl.u32 %v98_v49, 7  ;;  %vm4279_vm0 = vcmask 130112   ;;  %vm4286_vm1 = vcmask 195712  }
  0x21   :  { %287 = vmatpush1.bf16.msra.mxu0 %v4658_v4  ;;  %v56_v21 = vld [vmem:[%s6610_s0 + $0x20] sm:$0xff]   ;;  %v58_v22 = vld [vmem:[%s6610_s0 + $0x28] sm:$0xff]   ;;  %v60_v23 = vld [vmem:[%s6610_s0 + $0x30] sm:$0xff]   ;;  %vm4293_vm2 = vcmask 261312   ;;  %vm4300_vm3 = vcmask 326912   ;;  %vm4307_vm4 = vcmask 392512  }
  0x22   :  { %288 = vmatprep.subr.bf16.mxu0 %v4659_v5  ;;  %v62_v24 = vld [vmem:[%s6610_s0 + $0x38] sm:$0xff]   ;;  %v64_v25 = vld [vmem:[%s6610_s0 + $0x40] sm:$0xff]   ;;  %v66_v26 = vld [vmem:[%s6610_s0 + $0x48] sm:$0xff]   ;;  %v5124_v51 = vsub.s32 0, %v5121_v50  ;;  %v5130_v53 = vsub.s32 1, %v5121_v50  ;;  %vm4314_vm5 = vcmask 458112  }
  0x23   :  { %v68_v27 = vld [vmem:[%s6610_s0 + $0x50] sm:$0xff]   ;;  %v4693_v28 = vld [vmem:[%s6613_s3 + $0x78] sm:$0xff]   ;;  %v4697_v33 = vld [vmem:[%s6613_s3 + $0x68] sm:$0xff]   ;;  %vm4321_vm6 = vcmask 523712   ;;  %vm4328_vm7 = vcmask 589312   ;;  %vm4335_vm8 = vcmask 654912  }
  0x24   :  { %v4694_v29 = vld [vmem:[%s6613_s3 + $0x38] sm:$0xff]   ;;  %4535 = vmatprep.subr.bf16.mxu1 %v4693_v28  ;;  %v4695_v30 = vld [vmem:[%s6613_s3 + $0x70] sm:$0xff]   ;;  %v4698_v34 = vld [vmem:[%s6613_s3 + $0x28] sm:$0xff]   ;;  %vm4342_vm9 = vcmask 720512   ;;  %vm4349_vm10 = vcmask 786112   ;;  %vm4356_vm11 = vcmask 851712  }
  0x25   :  { %289 = vmatpush1.bf16.msra.mxu0 %v4661_v6  ;;  %4536 = vmatpush3.bf16.msra.mxu1 %v4694_v29  ;;  %v4696_v31 = vld [vmem:[%s6613_s3 + $0x30] sm:$0xff]   ;;  %v70_v32 = vld [vmem:[%s6610_s0 + $0x58] sm:$0xff]   ;;  %v4699_v35 = vld [vmem:[%s6613_s3 + $0x60] sm:$0xff]   ;;  %vm4363_vm12 = vcmask 917312   ;;  %vm4370_vm13 = vcmask 982912   ;;  %vm4377_vm14 = vcmask 1048512  }
  0x26   :  { %290 = vmatprep.subr.bf16.mxu0 %v4662_v7  ;;  %4537 = vmatprep.subr.bf16.mxu1 %v4695_v30  ;;  %v4700_v36 = vld [vmem:[%s6613_s3 + $0x20] sm:$0xff]   ;;  %v4701_v38 = vld [vmem:[%s6613_s3 + $0x58] sm:$0xff]   ;;  %v4703_v40 = vld [vmem:[%s6613_s3 + $0x50] sm:$0xff]   ;;  %vm4476_vm15 = vcmp.lt.s32.totalorder %v98_v49, 256 }
  0x27   :  { %v72_v37 = vld [vmem:[%s6610_s0 + $0x60] sm:$0xff]   ;;  %v4702_v39 = vld [vmem:[%s6613_s3 + $0x18] sm:$0xff]   ;;  %v4704_v41 = vld [vmem:[%s6613_s3 + $0x10] sm:$0xff]  }
  0x28   :  { %v74_v42 = vld [vmem:[%s6610_s0 + $0x68] sm:$0xff]   ;;  %v4707_v45 = vld [vmem:[%s6613_s3 + $0x40] sm:$0xff]   ;;  %v76_v47 = vld [vmem:[%s6610_s0 + $0x70] sm:$0xff]  }
  0x29   :  { %291 = vmatpush1.bf16.msra.mxu0 %v4664_v8  ;;  %4538 = vmatpush3.bf16.msra.mxu1 %v4696_v31  ;;  %v4705_v43 = vld [vmem:[%s6613_s3 + $0x48] sm:$0xff]   ;;  %v4708_v46 = vld [vmem:[%s6613_s3] sm:$0xff]   ;;  %v78_v48 = vld [vmem:[%s6610_s0 + $0x78] sm:$0xff]  }
  0x2a   :  { %292 = vmatprep.subr.bf16.mxu0 %v4665_v9  ;;  %4539 = vmatprep.subr.bf16.mxu1 %v4697_v33  ;;  %v4706_v44 = vld [vmem:[%s6613_s3 + $0x8] sm:$0xff]   ;;  %v96_v52 = vld [vmem:[%s6612_s2] sm:$0x3] }
  0x2b   :  { %v5133_v54 = vrot.slane %v96_v52, %v5124_v51  ;;  %v5136_v55 = vrot.slane %v96_v52, %v5130_v53 }
  0x2d   :  { %293 = vmatpush1.bf16.msra.mxu0 %v4667_v10  ;;  %4540 = vmatpush3.bf16.msra.mxu1 %v4698_v34 }
  0x2e   :  { %294 = vmatprep.subr.bf16.mxu0 %v4668_v11  ;;  %4541 = vmatprep.subr.bf16.mxu1 %v4699_v35 }
  0x31   :  { %295 = vmatpush1.bf16.msra.mxu0 %v4670_v12  ;;  %4542 = vmatpush3.bf16.msra.mxu1 %v4700_v36 }
  0x32   :  { %296 = vmatprep.subr.bf16.mxu0 %v4671_v13  ;;  %4543 = vmatprep.subr.bf16.mxu1 %v4701_v38 }
  0x35   :  { %297 = vmatpush1.bf16.msra.mxu0 %v4673_v14  ;;  %4544 = vmatpush3.bf16.msra.mxu1 %v4702_v39 }
  0x36   :  { %298 = vmatprep.subr.bf16.mxu0 %v4674_v15  ;;  %4545 = vmatprep.subr.bf16.mxu1 %v4703_v40 }
  0x39   :  { %299 = vmatpush1.bf16.msra.mxu0 %v4676_v16  ;;  %4546 = vmatpush3.bf16.msra.mxu1 %v4704_v41 }
  0x3a   :  { %4547 = vmatprep.subr.bf16.mxu1 %v4705_v43 }
  0x3c   :  { %317 = vmatmul.mubr.bf16.vlgmr.msra.gmra.mxu0 %v48_v17 }
  0x3d   :  { %326 = vmatprep.mubr.bf16.mxu0 %v4915_v0  ;;  %4548 = vmatpush3.bf16.msra.mxu1 %v4706_v44 }
  0x3e   :  { %4549 = vmatprep.subr.bf16.mxu1 %v4707_v45 }
  0x41   :  { %4550 = vmatpush3.bf16.msra.mxu1 %v4708_v46 }
  0x44   :  { %327 = vmatmul.mubr.bf16.gmra.mxu0 %v50_v18 }
  0x45   :  { %336 = vmatprep.mubr.bf16.mxu0 %v4915_v0 }
  0x4c   :  { %337 = vmatmul.mubr.bf16.gmra.mxu0 %v52_v19 }
  0x4d   :  { %346 = vmatprep.mubr.bf16.mxu0 %v4915_v0 }
  0x54   :  { %347 = vmatmul.mubr.bf16.gmra.mxu0 %v54_v20 }
  0x55   :  { %356 = vmatprep.mubr.bf16.mxu0 %v4915_v0 }
  0x5c   :  { %357 = vmatmul.mubr.bf16.gmra.mxu0 %v56_v21 }
  0x5d   :  { %366 = vmatprep.mubr.bf16.mxu0 %v4915_v0 }
  0x64   :  { %367 = vmatmul.mubr.bf16.gmra.mxu0 %v58_v22 }
  0x65   :  { %376 = vmatprep.mubr.bf16.mxu0 %v4915_v0 }
  0x6c   :  { %377 = vmatmul.mubr.bf16.gmra.mxu0 %v60_v23 }
  0x6d   :  { %386 = vmatprep.mubr.bf16.mxu0 %v4915_v0 }
  0x74   :  { %387 = vmatmul.mubr.bf16.gmra.mxu0 %v62_v24 }
  0x75   :  { %396 = vmatprep.mubr.bf16.mxu0 %v4915_v0 }
  0x7c   :  { %397 = vmatmul.mubr.bf16.gmra.mxu0 %v64_v25 }
  0x7d   :  { %406 = vmatprep.mubr.bf16.mxu0 %v4915_v0 }
  0x84   :  { %407 = vmatmul.mubr.bf16.gmra.mxu0 %v66_v26 }
  0x85   :  { %416 = vmatprep.mubr.bf16.mxu0 %v4915_v0 }
  0x8c   :  { %417 = vmatmul.mubr.bf16.gmra.mxu0 %v68_v27 }
  0x8d   :  { %426 = vmatprep.mubr.bf16.mxu0 %v4915_v0 }
  0x94   :  { %427 = vmatmul.mubr.bf16.gmra.mxu0 %v70_v32 }
  0x95   :  { %436 = vmatprep.mubr.bf16.mxu0 %v4915_v0 }
  0x9c   :  { %437 = vmatmul.mubr.bf16.gmra.mxu0 %v72_v37 }
  0x9d   :  { %446 = vmatprep.mubr.bf16.mxu0 %v4915_v0 }
  0xa4   :  { %447 = vmatmul.mubr.bf16.gmra.mxu0 %v74_v42 }
  0xa5   :  { %456 = vmatprep.mubr.bf16.mxu0 %v4915_v0 }
  0xac   :  { %457 = vmatmul.mubr.bf16.gmra.mxu0 %v76_v47 }
  0xad   :  { %466 = vmatprep.mubr.bf16.mxu0 %v4915_v0 }
  0xb4   :  { %467 = vmatmul.mubr.bf16.gmra.mxu0 %v78_v48 }
  0xfc   :  { %v318_v56 = vpop.f32.mrf.mxu0 }
  0xfd   :  { %v5139_v57 = vadd.f32 %v318_v56, %v5133_v54 }
  0xfe   :  { %v320_v58 = vpop.f32.mrf.mxu0 }
  0xff   :  { %v477_v59 = vmul.f32 %v5139_v57, %v5139_v57  ;;  %v5144_v60 = vadd.f32 %v320_v58, %v5136_v55 }
 0x100   :  { %v322_v61 = vpop.f32.mrf.mxu0 }
 0x101   :  { %v541_v62 = vmul.f32 %v477_v59, %v5139_v57  ;;  %v478_v63 = vmul.f32 %v5144_v60, %v5144_v60  ;;  %v5150_v0 = vadd.f32 %v322_v61, %v5133_v54 }
 0x102   :  { %v324_v1 = vpop.f32.mrf.mxu0 }
 0x103   :  { %v605_v2 = vmul.f32 0.044715, %v541_v62  ;;  %v542_v3 = vmul.f32 %v478_v63, %v5144_v60  ;;  %v479_v4 = vmul.f32 %v5150_v0, %v5150_v0  ;;  %v5156_v5 = vadd.f32 %v324_v1, %v5136_v55 }
 0x104   :  { %v328_v6 = vpop.f32.mrf.mxu0 }
 0x105   :  { %v669_v7 = vadd.f32 %v605_v2, %v5139_v57  ;;  %v606_v8 = vmul.f32 0.044715, %v542_v3  ;;  %v543_v9 = vmul.f32 %v479_v4, %v5150_v0  ;;  %v480_v10 = vmul.f32 %v5156_v5, %v5156_v5 }
 0x106   :  { %v5163_v11 = vadd.f32 %v328_v6, %v5133_v54  ;;  %v330_v12 = vpop.f32.mrf.mxu0 }
 0x107   :  { %v733_v13 = vmul.f32 0.7978846, %v669_v7  ;;  %v670_v14 = vadd.f32 %v606_v8, %v5144_v60  ;;  %v607_v15 = vmul.f32 0.044715, %v543_v9  ;;  %v544_v16 = vmul.f32 %v480_v10, %v5156_v5 }
 0x108   :  { %v481_v17 = vmul.f32 %v5163_v11, %v5163_v11  ;;  %v5170_v18 = vadd.f32 %v330_v12, %v5136_v55  ;;  %v332_v19 = vpop.f32.mrf.mxu0 }
 0x109   :  { %4725 = vtanh.f32 %v733_v13  ;;  %v608_v20 = vmul.f32 0.044715, %v544_v16  ;;  %v5173_v21 = vadd.f32 %v332_v19, %v5133_v54  ;;  %v671_v22 = vadd.f32 %v607_v15, %v5150_v0 }
 0x10a   :  { %v545_v23 = vmul.f32 %v481_v17, %v5163_v11  ;;  %v482_v24 = vmul.f32 %v5170_v18, %v5170_v18  ;;  %v334_v25 = vpop.f32.mrf.mxu0  ;;  %v734_v26 = vmul.f32 0.7978846, %v670_v14 }
 0x10b   :  { %v672_v27 = vadd.f32 %v608_v20, %v5156_v5  ;;  %v483_v28 = vmul.f32 %v5173_v21, %v5173_v21  ;;  %v5183_v29 = vadd.f32 %v334_v25, %v5136_v55  ;;  %v735_v36 = vmul.f32 0.7978846, %v671_v22 }
 0x10c   :  { %v609_v30 = vmul.f32 0.044715, %v545_v23  ;;  %v546_v31 = vmul.f32 %v482_v24, %v5170_v18  ;;  %v338_v32 = vpop.f32.mrf.mxu0  ;;  %4727 = vtanh.f32 %v734_v26 }
 0x10d   :  { %v547_v33 = vmul.f32 %v483_v28, %v5173_v21  ;;  %v484_v34 = vmul.f32 %v5183_v29, %v5183_v29  ;;  %v5190_v35 = vadd.f32 %v338_v32, %v5133_v54  ;;  %v736_v40 = vmul.f32 0.7978846, %v672_v27 }
 0x10e   :  { %v673_v37 = vadd.f32 %v609_v30, %v5163_v11  ;;  %v610_v38 = vmul.f32 0.044715, %v546_v31  ;;  %v340_v39 = vpop.f32.mrf.mxu0 }
 0x10f   :  { %v611_v41 = vmul.f32 0.044715, %v547_v33  ;;  %v548_v42 = vmul.f32 %v484_v34, %v5183_v29  ;;  %v485_v43 = vmul.f32 %v5190_v35, %v5190_v35  ;;  %v5197_v44 = vadd.f32 %v340_v39, %v5136_v55 }
 0x110   :  { %v737_v45 = vmul.f32 0.7978846, %v673_v37  ;;  %v674_v46 = vadd.f32 %v610_v38, %v5170_v18  ;;  %v342_v47 = vpop.f32.mrf.mxu0  ;;  %4729 = vtanh.f32 %v736_v40 }
 0x111   :  { %v675_v48 = vadd.f32 %v611_v41, %v5173_v21  ;;  %v612_v52 = vmul.f32 0.044715, %v548_v42  ;;  %v549_v56 = vmul.f32 %v485_v43, %v5190_v35  ;;  %v486_v58 = vmul.f32 %v5197_v44, %v5197_v44 }
 0x112   :  { %4731 = vtanh.f32 %v735_v36  ;;  %v738_v59 = vmul.f32 0.7978846, %v674_v46  ;;  %v5205_v61 = vadd.f32 %v342_v47, %v5133_v54  ;;  %v344_v62 = vpop.f32.mrf.mxu0 }
 0x113   :  { %v739_v63 = vmul.f32 0.7978846, %v675_v48  ;;  %v676_v1 = vadd.f32 %v612_v52, %v5183_v29  ;;  %v613_v2 = vmul.f32 0.044715, %v549_v56  ;;  %v550_v3 = vmul.f32 %v486_v58, %v5197_v44 }
 0x114   :  { %4733 = vtanh.f32 %v737_v45  ;;  %v487_v4 = vmul.f32 %v5205_v61, %v5205_v61  ;;  %v5212_v6 = vadd.f32 %v344_v62, %v5136_v55  ;;  %v348_v7 = vpop.f32.mrf.mxu0 }
 0x115   :  { %4735 = vtanh.f32 %v738_v59  ;;  %v740_v8 = vmul.f32 0.7978846, %v676_v1  ;;  %v677_v9 = vadd.f32 %v613_v2, %v5190_v35  ;;  %v614_v10 = vmul.f32 0.044715, %v550_v3 }
 0x116   :  { %v4726_v12 = vpop.eup %4725  ;;  %4737 = vtanh.f32 %v739_v63  ;;  %v551_v13 = vmul.f32 %v487_v4, %v5205_v61  ;;  %v488_v14 = vmul.f32 %v5212_v6, %v5212_v6  ;;  %v5219_v15 = vadd.f32 %v348_v7, %v5133_v54  ;;  %v350_v16 = vpop.f32.mrf.mxu0 }
 0x117   :  { %4739 = vtanh.f32 %v740_v8  ;;  %v741_v17 = vmul.f32 0.7978846, %v677_v9  ;;  %v678_v19 = vadd.f32 %v614_v10, %v5197_v44  ;;  %v5223_v20 = vadd.f32 %v350_v16, %v5136_v55 }
 0x118   :  { %v615_v22 = vmul.f32 0.044715, %v551_v13  ;;  %v552_v23 = vmul.f32 %v488_v14, %v5212_v6  ;;  %v489_v24 = vmul.f32 %v5219_v15, %v5219_v15  ;;  %v352_v25 = vpop.f32.mrf.mxu0  ;;  %v5228_v26 = vadd.f32 1.0, %v4726_v12 }
 0x119   :  { %v4728_v27 = vpop.eup %4727  ;;  %4741 = vtanh.f32 %v741_v17  ;;  %v742_v28 = vmul.f32 0.7978846, %v678_v19  ;;  %v490_v30 = vmul.f32 %v5223_v20, %v5223_v20  ;;  %v5233_v31 = vadd.f32 %v352_v25, %v5133_v54 }
 0x11a   :  { %v679_v32 = vadd.f32 %v615_v22, %v5205_v61  ;;  %v616_v33 = vmul.f32 0.044715, %v552_v23  ;;  %v553_v34 = vmul.f32 %v489_v24, %v5219_v15  ;;  %v354_v36 = vpop.f32.mrf.mxu0  ;;  %v862_v37 = vadd.f32 1.0, %v4728_v27 }
 0x11b   :  { %4743 = vtanh.f32 %v742_v28  ;;  %v554_v38 = vmul.f32 %v490_v30, %v5223_v20  ;;  %v491_v39 = vmul.f32 %v5233_v31, %v5233_v31  ;;  %v5241_v40 = vadd.f32 %v354_v36, %v5136_v55 }
 0x11c   :  { %v743_v41 = vmul.f32 0.7978846, %v679_v32  ;;  %v680_v42 = vadd.f32 %v616_v33, %v5212_v6  ;;  %v617_v43 = vmul.f32 0.044715, %v553_v34  ;;  %v358_v45 = vpop.f32.mrf.mxu0  ;;  %v926_v46 = vmul.f32 0.5, %v862_v37 }
 0x11d   :  { %v4730_v47 = vpop.eup %4729  ;;  %v618_v48 = vmul.f32 0.044715, %v554_v38  ;;  %v555_v52 = vmul.f32 %v491_v39, %v5233_v31  ;;  %v492_v56 = vmul.f32 %v5241_v40, %v5241_v40  ;;  %v5248_v58 = vadd.f32 %v358_v45, %v5133_v54 }
 0x11e   :  { %4745 = vtanh.f32 %v743_v41  ;;  %v744_v59 = vmul.f32 0.7978846, %v680_v42  ;;  %v681_v62 = vadd.f32 %v617_v43, %v5219_v15  ;;  %v360_v63 = vpop.f32.mrf.mxu0  ;;  %v864_v1 = vadd.f32 1.0, %v4730_v47 }
 0x11f   :  { %v4732_v2 = vpop.eup %4731  ;;  %v682_v3 = vadd.f32 %v618_v48, %v5223_v20  ;;  %v619_v4 = vmul.f32 0.044715, %v555_v52  ;;  %v556_v7 = vmul.f32 %v492_v56, %v5241_v40  ;;  %v493_v8 = vmul.f32 %v5248_v58, %v5248_v58 }
 0x120   :  { %4747 = vtanh.f32 %v744_v59  ;;  %v745_v9 = vmul.f32 0.7978846, %v681_v62  ;;  %v5256_v10 = vadd.f32 %v360_v63, %v5136_v55  ;;  %v362_v12 = vpop.f32.mrf.mxu0  ;;  %v928_v13 = vmul.f32 0.5, %v864_v1 }
 0x121   :  { %v5258_v14 = vpop.eup %4733  ;;  %v746_v16 = vmul.f32 0.7978846, %v682_v3  ;;  %v683_v17 = vadd.f32 %v619_v4, %v5233_v31  ;;  %v620_v19 = vmul.f32 0.044715, %v556_v7  ;;  %v557_v22 = vmul.f32 %v493_v8, %v5248_v58 }
 0x122   :  { %v5262_v23 = vpop.eup %4735  ;;  %4749 = vtanh.f32 %v745_v9  ;;  %v494_v24 = vmul.f32 %v5256_v10, %v5256_v10  ;;  %v5267_v25 = vadd.f32 %v362_v12, %v5133_v54  ;;  %v364_v27 = vpop.f32.mrf.mxu0  ;;  %v990_v28 = vmul.f32 %v926_v46, %v5144_v60 }
 0x123   :  { %v5270_v30 = vpop.eup %4737  ;;  %4751 = vtanh.f32 %v746_v16  ;;  %v747_v32 = vmul.f32 0.7978846, %v683_v17  ;;  %v684_v33 = vadd.f32 %v620_v19, %v5241_v40  ;;  %v621_v34 = vmul.f32 0.044715, %v557_v22 }
 0x124   :  { %v5273_v36 = vpop.eup %4739  ;;  %v558_v37 = vmul.f32 %v494_v24, %v5256_v10  ;;  %v495_v38 = vmul.f32 %v5267_v25, %v5267_v25  ;;  %v5279_v39 = vadd.f32 %v364_v27, %v5136_v55  ;;  %v368_v41 = vpop.f32.mrf.mxu0  ;;  %v992_v60 = vmul.f32 %v928_v13, %v5156_v5 }
 0x125   :  { %4753 = vtanh.f32 %v747_v32  ;;  %v748_v42 = vmul.f32 0.7978846, %v684_v33  ;;  %v685_v43 = vadd.f32 %v621_v34, %v5248_v58  ;;  %v5284_v45 = vadd.f32 %v368_v41, %v5133_v54 }
 0x126   :  { %v5286_v46 = vpop.eup %4741  ;;  %v622_v47 = vmul.f32 0.044715, %v558_v37  ;;  %v559_v48 = vmul.f32 %v495_v38, %v5267_v25  ;;  %v496_v52 = vmul.f32 %v5279_v39, %v5279_v39  ;;  %v1054_v56 = vpack.c.bf16 %v992_v60, %v990_v28  ;;  %v370_v59 = vpop.f32.mrf.mxu0 }
 0x127   :  { %4755 = vtanh.f32 %v748_v42  ;;  %v749_v62 = vmul.f32 0.7978846, %v685_v43  ;;  %v497_v5 = vmul.f32 %v5284_v45, %v5284_v45  ;;  %v5294_v63 = vadd.f32 %v370_v59, %v5136_v55 }
 0x128   :  { %v5296_v1 = vpop.eup %4743  ;;  %v686_v3 = vadd.f32 %v622_v47, %v5256_v10  ;;  %v623_v4 = vmul.f32 0.044715, %v559_v48  ;;  %v560_v7 = vmul.f32 %v496_v52, %v5279_v39  ;;  %1252 = vmatprep.mubr.bf16.mxu1 %v1054_v56  ;;  %v863_v8 = vadd.f32 1.0, %v4732_v2  ;;  %v372_v9 = vpop.f32.mrf.mxu0 }
 0x129   :  { %4757 = vtanh.f32 %v749_v62  ;;  %v561_v12 = vmul.f32 %v497_v5, %v5284_v45  ;;  %v498_v13 = vmul.f32 %v5294_v63, %v5294_v63  ;;  %v925_v16 = vmul.f32 0.5, %v5228_v26 }
 0x12a   :  { %v750_v17 = vmul.f32 0.7978846, %v686_v3  ;;  %v687_v19 = vadd.f32 %v623_v4, %v5267_v25  ;;  %v624_v22 = vmul.f32 0.044715, %v560_v7  ;;  %v927_v24 = vmul.f32 0.5, %v863_v8  ;;  %v374_v27 = vpop.f32.mrf.mxu0 }
 0x12b   :  { %v5305_v28 = vpop.eup %4745  ;;  %v625_v32 = vmul.f32 0.044715, %v561_v12  ;;  %v562_v2 = vmul.f32 %v498_v13, %v5294_v63  ;;  %v989_v33 = vmul.f32 %v925_v16, %v5139_v57  ;;  %v5310_v34 = vadd.f32 %v372_v9, %v5133_v54 }
 0x12c   :  { %4759 = vtanh.f32 %v750_v17  ;;  %v751_v37 = vmul.f32 0.7978846, %v687_v19  ;;  %v688_v26 = vadd.f32 %v624_v22, %v5279_v39  ;;  %v991_v38 = vmul.f32 %v927_v24, %v5150_v0  ;;  %v378_v41 = vpop.f32.mrf.mxu0 }
 0x12d   :  { %v5314_v60 = vpop.eup %4747  ;;  %v689_v42 = vadd.f32 %v625_v32, %v5284_v45  ;;  %v626_v43 = vmul.f32 0.044715, %v562_v2  ;;  %v499_v47 = vmul.f32 %v5310_v34, %v5310_v34  ;;  %v5320_v57 = vadd.f32 %v374_v27, %v5136_v55 }
 0x12e   :  { %4761 = vtanh.f32 %v751_v37  ;;  %v752_v48 = vmul.f32 0.7978846, %v688_v26  ;;  %v1053_v52 = vpack.c.bf16 %v991_v38, %v989_v33  ;;  %v5323_v56 = vadd.f32 %v378_v41, %v5133_v54  ;;  %v380_v59 = vpop.f32.mrf.mxu0 }
 0x12f   :  { %v5325_v0 = vpop.eup %4749  ;;  %v753_v62 = vmul.f32 0.7978846, %v689_v42  ;;  %v690_v5 = vadd.f32 %v626_v43, %v5294_v63  ;;  %v563_v3 = vmul.f32 %v499_v47, %v5310_v34  ;;  %v500_v4 = vmul.f32 %v5320_v57, %v5320_v57 }
 0x130   :  { %v5331_v7 = vpop.eup %4751  ;;  %4763 = vtanh.f32 %v752_v48  ;;  %1253 = vmatmul.mubr.bf16.vlgmr.msra.gmra.mxu1 %v1053_v52  ;;  %v501_v8 = vmul.f32 %v5323_v56, %v5323_v56  ;;  %v866_v9 = vadd.f32 1.0, %v5262_v23  ;;  %v868_v12 = vadd.f32 1.0, %v5273_v36  ;;  %v382_v13 = vpop.f32.mrf.mxu0 }
 0x131   :  { %4765 = vtanh.f32 %v753_v62  ;;  %v754_v16 = vmul.f32 0.7978846, %v690_v5  ;;  %v627_v17 = vmul.f32 0.044715, %v563_v3  ;;  %v564_v19 = vmul.f32 %v500_v4, %v5320_v57 }
 0x132   :  { %v5338_v22 = vpop.eup %4753  ;;  %v565_v24 = vmul.f32 %v501_v8, %v5323_v56  ;;  %v930_v27 = vmul.f32 0.5, %v866_v9  ;;  %v932_v32 = vmul.f32 0.5, %v868_v12  ;;  %v5342_v2 = vadd.f32 %v380_v59, %v5136_v55  ;;  %v384_v33 = vpop.f32.mrf.mxu0 }
 0x133   :  { %4767 = vtanh.f32 %v754_v16  ;;  %v691_v23 = vadd.f32 %v627_v17, %v5310_v34  ;;  %v628_v36 = vmul.f32 0.044715, %v564_v19  ;;  %v865_v37 = vadd.f32 1.0, %v5258_v14 }
 0x134   :  { %v5346_v26 = vpop.eup %4755  ;;  %v629_v38 = vmul.f32 0.044715, %v565_v24  ;;  %v994_v41 = vmul.f32 %v930_v27, %v5170_v18  ;;  %v996_v42 = vmul.f32 %v932_v32, %v5183_v29  ;;  %v502_v43 = vmul.f32 %v5342_v2, %v5342_v2  ;;  %v388_v47 = vpop.f32.mrf.mxu0 }
 0x135   :  { %v755_v48 = vmul.f32 0.7978846, %v691_v23  ;;  %v692_v52 = vadd.f32 %v628_v36, %v5320_v57  ;;  %v867_v59 = vadd.f32 1.0, %v5270_v30  ;;  %v929_v62 = vmul.f32 0.5, %v865_v37 }
 0x136   :  { %v5354_v5 = vpop.eup %4757  ;;  %v693_v14 = vadd.f32 %v629_v38, %v5323_v56  ;;  %v1056_v3 = vpack.c.bf16 %v996_v42, %v994_v41  ;;  %v566_v4 = vmul.f32 %v502_v43, %v5342_v2  ;;  %v5359_v18 = vadd.f32 %v382_v13, %v5133_v54  ;;  %v390_v29 = vpop.f32.mrf.mxu0 }
 0x137   :  { %4769 = vtanh.f32 %v755_v48  ;;  %v756_v8 = vmul.f32 0.7978846, %v692_v52  ;;  %v931_v9 = vmul.f32 0.5, %v867_v59  ;;  %v993_v12 = vmul.f32 %v929_v62, %v5163_v11 }
 0x138   :  { %v757_v16 = vmul.f32 0.7978846, %v693_v14  ;;  %1260 = vmatprep.mubr.bf16.mxu1 %v1056_v3  ;;  %v630_v30 = vmul.f32 0.044715, %v566_v4  ;;  %v503_v17 = vmul.f32 %v5359_v18, %v5359_v18  ;;  %v5365_v19 = vadd.f32 %v384_v33, %v5136_v55  ;;  %v392_v24 = vpop.f32.mrf.mxu0 }
 0x139   :  { %v5367_v27 = vpop.eup %4759  ;;  %4771 = vtanh.f32 %v756_v8  ;;  %v995_v13 = vmul.f32 %v931_v9, %v5173_v21  ;;  %v5371_v32 = vadd.f32 %v388_v47, %v5133_v54  ;;  %v870_v11 = vadd.f32 1.0, %v5296_v1 }
 0x13a   :  { %4773 = vtanh.f32 %v757_v16  ;;  %v694_v23 = vadd.f32 %v630_v30, %v5342_v2  ;;  %v567_v36 = vmul.f32 %v503_v17, %v5359_v18  ;;  %v504_v33 = vmul.f32 %v5365_v19, %v5365_v19  ;;  %v394_v37 = vpop.f32.mrf.mxu0 }
 0x13b   :  { %v5378_v38 = vpop.eup %4761  ;;  %v1055_v41 = vpack.c.bf16 %v995_v13, %v993_v12  ;;  %v505_v21 = vmul.f32 %v5371_v32, %v5371_v32  ;;  %v872_v42 = vadd.f32 1.0, %v5314_v60  ;;  %v934_v43 = vmul.f32 0.5, %v870_v11 }
 0x13c   :  { %v758_v47 = vmul.f32 0.7978846, %v694_v23  ;;  %v631_v1 = vmul.f32 0.044715, %v567_v36  ;;  %v568_v48 = vmul.f32 %v504_v33, %v5365_v19  ;;  %v5385_v52 = vadd.f32 %v390_v29, %v5136_v55  ;;  %v398_v59 = vpop.f32.mrf.mxu0 }
 0x13d   :  { %v5387_v62 = vpop.eup %4763  ;;  %1261 = vmatmul.mubr.bf16.gmra.mxu1 %v1055_v41  ;;  %v569_v14 = vmul.f32 %v505_v21, %v5371_v32  ;;  %v936_v3 = vmul.f32 0.5, %v872_v42  ;;  %v998_v4 = vmul.f32 %v934_v43, %v5197_v44  ;;  %v869_v8 = vadd.f32 1.0, %v5286_v46 }
 0x13e   :  { %v5392_v60 = vpop.eup %4765  ;;  %4775 = vtanh.f32 %v758_v47  ;;  %v695_v9 = vadd.f32 %v631_v1, %v5359_v18  ;;  %v632_v12 = vmul.f32 0.044715, %v568_v48  ;;  %v506_v29 = vmul.f32 %v5385_v52, %v5385_v52  ;;  %v400_v16 = vpop.f32.mrf.mxu0 }
 0x13f   :  { %v633_v30 = vmul.f32 0.044715, %v569_v14  ;;  %v1000_v17 = vmul.f32 %v936_v3, %v5212_v6  ;;  %v871_v13 = vadd.f32 1.0, %v5305_v28  ;;  %v933_v11 = vmul.f32 0.5, %v869_v8 }
 0x140   :  { %v5399_v23 = vpop.eup %4767  ;;  %v759_v44 = vmul.f32 0.7978846, %v695_v9  ;;  %v696_v46 = vadd.f32 %v632_v12, %v5365_v19  ;;  %v570_v36 = vmul.f32 %v506_v29, %v5385_v52  ;;  %v5404_v33 = vadd.f32 %v392_v24, %v5133_v54  ;;  %v402_v41 = vpop.f32.mrf.mxu0 }
 0x141   :  { %v697_v21 = vadd.f32 %v633_v30, %v5371_v32  ;;  %v1058_v42 = vpack.c.bf16 %v1000_v17, %v998_v4  ;;  %v935_v43 = vmul.f32 0.5, %v871_v13  ;;  %v997_v6 = vmul.f32 %v933_v11, %v5190_v35 }
 0x142   :  { %4777 = vtanh.f32 %v759_v44  ;;  %v760_v28 = vmul.f32 0.7978846, %v696_v46  ;;  %v634_v47 = vmul.f32 0.044715, %v570_v36  ;;  %v507_v1 = vmul.f32 %v5404_v33, %v5404_v33  ;;  %v404_v48 = vpop.f32.mrf.mxu0 }
 0x143   :  { %v761_v14 = vmul.f32 0.7978846, %v697_v21  ;;  %1268 = vmatprep.mubr.bf16.mxu1 %v1058_v42  ;;  %v999_v3 = vmul.f32 %v935_v43, %v5205_v61  ;;  %v5412_v24 = vadd.f32 %v394_v37, %v5136_v55  ;;  %v5415_v8 = vadd.f32 %v398_v59, %v5133_v54 }
 0x144   :  { %v5417_v4 = vpop.eup %4769  ;;  %4779 = vtanh.f32 %v760_v28  ;;  %v698_v35 = vadd.f32 %v634_v47, %v5385_v52  ;;  %v571_v9 = vmul.f32 %v507_v1, %v5404_v33  ;;  %v874_v12 = vadd.f32 1.0, %v5331_v7  ;;  %v408_v29 = vpop.f32.mrf.mxu0 }
 0x145   :  { %4781 = vtanh.f32 %v761_v14  ;;  %v1057_v30 = vpack.c.bf16 %v999_v3, %v997_v6  ;;  %v508_v61 = vmul.f32 %v5412_v24, %v5412_v24  ;;  %v509_v37 = vmul.f32 %v5415_v8, %v5415_v8 }
 0x146   :  { %v5426_v59 = vpop.eup %4771  ;;  %v762_v17 = vmul.f32 0.7978846, %v698_v35  ;;  %v635_v13 = vmul.f32 0.044715, %v571_v9  ;;  %v876_v11 = vadd.f32 1.0, %v5346_v26  ;;  %v938_v44 = vmul.f32 0.5, %v874_v12  ;;  %v410_v46 = vpop.f32.mrf.mxu0 }
 0x147   :  { %v5429_v36 = vpop.eup %4773  ;;  %1269 = vmatmul.mubr.bf16.gmra.mxu1 %v1057_v30  ;;  %v572_v7 = vmul.f32 %v508_v61, %v5412_v24  ;;  %v573_v21 = vmul.f32 %v509_v37, %v5415_v8  ;;  %v5434_v42 = vadd.f32 %v400_v16, %v5136_v55  ;;  %v873_v43 = vadd.f32 1.0, %v5325_v0 }
 0x148   :  { %4783 = vtanh.f32 %v762_v17  ;;  %v699_v6 = vadd.f32 %v635_v13, %v5404_v33  ;;  %v940_v28 = vmul.f32 0.5, %v876_v11  ;;  %v1002_v26 = vmul.f32 %v938_v44, %v5223_v20  ;;  %v412_v47 = vpop.f32.mrf.mxu0 }
 0x149   :  { %v636_v1 = vmul.f32 0.044715, %v572_v7  ;;  %v637_v14 = vmul.f32 0.044715, %v573_v21  ;;  %v510_v3 = vmul.f32 %v5434_v42, %v5434_v42  ;;  %v875_v35 = vadd.f32 1.0, %v5338_v22 }
 0x14a   :  { %v763_v9 = vmul.f32 0.7978846, %v699_v6  ;;  %v1004_v16 = vmul.f32 %v940_v28, %v5241_v40  ;;  %v937_v12 = vmul.f32 0.5, %v873_v43  ;;  %v5444_v0 = vadd.f32 %v402_v41, %v5133_v54  ;;  %v5446_v30 = vpop.f32.mrf.mxu0 }
 0x14b   :  { %v5448_v61 = vpop.eup %4775  ;;  %v700_v20 = vadd.f32 %v636_v1, %v5412_v24  ;;  %v701_v37 = vadd.f32 %v637_v14, %v5415_v8  ;;  %v574_v17 = vmul.f32 %v510_v3, %v5434_v42  ;;  %v939_v13 = vmul.f32 0.5, %v875_v35 }
 0x14c   :  { %4785 = vtanh.f32 %v763_v9  ;;  %v1060_v22 = vpack.c.bf16 %v1004_v16, %v1002_v26  ;;  %v511_v40 = vmul.f32 %v5444_v0, %v5444_v0  ;;  %v418_v11 = vpop.f32.mrf.mxu0  ;;  %v1001_v7 = vmul.f32 %v937_v12, %v5219_v15 }
 0x14d   :  { %v764_v44 = vmul.f32 0.7978846, %v700_v20  ;;  %v638_v41 = vmul.f32 0.044715, %v574_v17  ;;  %v1003_v21 = vmul.f32 %v939_v13, %v5233_v31  ;;  %v5459_v6 = vadd.f32 %v404_v48, %v5136_v55 }
 0x14e   :  { %1276 = vmatprep.mubr.bf16.mxu1 %v1060_v22  ;;  %v575_v43 = vmul.f32 %v511_v40, %v5444_v0  ;;  %v5462_v28 = vadd.f32 %v408_v29, %v5133_v54  ;;  %v878_v26 = vadd.f32 1.0, %v5367_v27  ;;  %v5465_v1 = vpop.f32.mrf.mxu0  ;;  %v765_v3 = vmul.f32 0.7978846, %v701_v37 }
 0x14f   :  { %v5467_v14 = vpop.eup %4777  ;;  %v702_v15 = vadd.f32 %v638_v41, %v5434_v42  ;;  %v1059_v35 = vpack.c.bf16 %v1003_v21, %v1001_v7  ;;  %v880_v31 = vadd.f32 1.0, %v5387_v62  ;;  %4787 = vtanh.f32 %v764_v44 }
 0x150   :  { %v639_v9 = vmul.f32 0.044715, %v575_v43  ;;  %v512_v48 = vmul.f32 %v5459_v6, %v5459_v6  ;;  %v513_v29 = vmul.f32 %v5462_v28, %v5462_v28  ;;  %v5475_v16 = vpop.f32.mrf.mxu0  ;;  %v942_v20 = vmul.f32 0.5, %v878_v26 }
 0x151   :  { %v5477_v27 = vpop.eup %4779  ;;  %v766_v12 = vmul.f32 0.7978846, %v702_v15  ;;  %1277 = vmatmul.mubr.bf16.gmra.mxu1 %v1059_v35  ;;  %v944_v37 = vmul.f32 0.5, %v880_v31  ;;  %v5480_v17 = vadd.f32 %v410_v46, %v5136_v55  ;;  %v877_v44 = vadd.f32 1.0, %v5354_v5 }
 0x152   :  { %v5482_v62 = vpop.eup %4781  ;;  %v703_v13 = vadd.f32 %v639_v9, %v5444_v0  ;;  %v576_v22 = vmul.f32 %v512_v48, %v5459_v6  ;;  %v577_v40 = vmul.f32 %v513_v29, %v5462_v28  ;;  %v5488_v41 = vpop.f32.mrf.mxu0  ;;  %4789 = vtanh.f32 %v765_v3 }
 0x153   :  { %v1006_v7 = vmul.f32 %v942_v20, %v5256_v10  ;;  %v1008_v21 = vmul.f32 %v944_v37, %v5279_v39  ;;  %v514_v46 = vmul.f32 %v5480_v17, %v5480_v17  ;;  %4791 = vtanh.f32 %v766_v12 }
 0x154   :  { %v640_v43 = vmul.f32 0.044715, %v576_v22  ;;  %v641_v26 = vmul.f32 0.044715, %v577_v40  ;;  %v5495_v15 = vadd.f32 %v412_v47, %v5133_v54  ;;  %v5497_v35 = vpop.f32.mrf.mxu0  ;;  %v879_v10 = vadd.f32 1.0, %v5378_v38 }
 0x155   :  { %v5499_v31 = vpop.eup %4783  ;;  %v1062_v5 = vpack.c.bf16 %v1008_v21, %v1006_v7  ;;  %v578_v3 = vmul.f32 %v514_v46, %v5480_v17  ;;  %v941_v9 = vmul.f32 0.5, %v877_v44  ;;  %v767_v39 = vmul.f32 0.7978846, %v703_v13 }
 0x156   :  { %v704_v48 = vadd.f32 %v640_v43, %v5459_v6  ;;  %v705_v29 = vadd.f32 %v641_v26, %v5462_v28  ;;  %v515_v12 = vmul.f32 %v5495_v15, %v5495_v15  ;;  %v5507_v47 = vpop.f32.mrf.mxu0  ;;  %v943_v37 = vmul.f32 0.5, %v879_v10 }
 0x157   :  { %1284 = vmatprep.mubr.bf16.mxu1 %v1062_v5  ;;  %v642_v20 = vmul.f32 0.044715, %v578_v3  ;;  %v1005_v22 = vmul.f32 %v941_v9, %v5248_v58  ;;  %v5512_v40 = vadd.f32 %v5446_v30, %v5136_v55  ;;  %v5516_v7 = vadd.f32 %v418_v11, %v5133_v54 }
 0x158   :  { %v768_v38 = vmul.f32 0.7978846, %v704_v48  ;;  %v769_v13 = vmul.f32 0.7978846, %v705_v29  ;;  %v579_v44 = vmul.f32 %v515_v12, %v5495_v15  ;;  %v5518_v21 = vpop.f32.mrf.mxu0  ;;  %v1007_v26 = vmul.f32 %v943_v37, %v5267_v25 }
 0x159   :  { %v5520_v46 = vpop.eup %4785  ;;  %v706_v43 = vadd.f32 %v642_v20, %v5480_v17  ;;  %v516_v58 = vmul.f32 %v5512_v40, %v5512_v40  ;;  %v882_v30 = vadd.f32 1.0, %v5399_v23  ;;  %4793 = vtanh.f32 %v767_v39 }
 0x15a   :  { %v643_v5 = vmul.f32 0.044715, %v579_v44  ;;  %v517_v3 = vmul.f32 %v5516_v7, %v5516_v7  ;;  %v884_v11 = vadd.f32 1.0, %v5426_v59  ;;  %v5530_v10 = vpop.f32.mrf.mxu0  ;;  %4795 = vtanh.f32 %v768_v38 }
 0x15b   :  { %v770_v9 = vmul.f32 0.7978846, %v706_v43  ;;  %v1061_v48 = vpack.c.bf16 %v1007_v26, %v1005_v22  ;;  %v580_v29 = vmul.f32 %v516_v58, %v5512_v40  ;;  %v946_v20 = vmul.f32 0.5, %v882_v30 }
 0x15c   :  { %v707_v25 = vadd.f32 %v643_v5, %v5495_v15  ;;  %v581_v12 = vmul.f32 %v517_v3, %v5516_v7  ;;  %v948_v23 = vmul.f32 0.5, %v884_v11  ;;  %v5535_v39 = vpop.f32.mrf.mxu0  ;;  %v5537_v37 = vpop.eup %4787  ;;  %4797 = vtanh.f32 %v769_v13 }
 0x15d   :  { %1285 = vmatmul.mubr.bf16.gmra.mxu1 %v1061_v48  ;;  %v644_v59 = vmul.f32 0.044715, %v580_v29  ;;  %v5541_v38 = vadd.f32 %v5465_v1, %v5136_v55  ;;  %v881_v22 = vadd.f32 1.0, %v5392_v60  ;;  %v1010_v26 = vmul.f32 %v946_v20, %v5294_v63 }
 0x15e   :  { %v771_v44 = vmul.f32 0.7978846, %v707_v25  ;;  %v645_v43 = vmul.f32 0.044715, %v581_v12  ;;  %v1012_v58 = vmul.f32 %v948_v23, %v5320_v57  ;;  %v5546_v30 = vpop.f32.mrf.mxu0  ;;  %v883_v3 = vadd.f32 1.0, %v5417_v4 }
 0x15f   :  { %v708_v5 = vadd.f32 %v644_v59, %v5512_v40  ;;  %v518_v13 = vmul.f32 %v5541_v38, %v5541_v38  ;;  %v945_v11 = vmul.f32 0.5, %v881_v22  ;;  %v5552_v1 = vpop.eup %4789  ;;  %4799 = vtanh.f32 %v770_v9 }
 0x160   :  { %v709_v60 = vadd.f32 %v645_v43, %v5516_v7  ;;  %v1064_v48 = vpack.c.bf16 %v1012_v58, %v1010_v26  ;;  %v5557_v63 = vadd.f32 %v5475_v16, %v5133_v54  ;;  %v5559_v57 = vpop.f32.mrf.mxu0  ;;  %v5561_v29 = vpop.eup %4791  ;;  %4801 = vtanh.f32 %v771_v44 }
 0x161   :  { %v582_v25 = vmul.f32 %v518_v13, %v5541_v38  ;;  %v947_v12 = vmul.f32 0.5, %v883_v3  ;;  %v772_v4 = vmul.f32 0.7978846, %v708_v5  ;;  %v5568_v20 = vadd.f32 %v5488_v41, %v5136_v55 }
 0x162   :  { %1292 = vmatprep.mubr.bf16.mxu1 %v1064_v48  ;;  %v519_v9 = vmul.f32 %v5557_v63, %v5557_v63  ;;  %v5572_v16 = vadd.f32 %v5497_v35, %v5133_v54  ;;  %v1009_v59 = vmul.f32 %v945_v11, %v5284_v45  ;;  %v886_v44 = vadd.f32 1.0, %v5448_v61  ;;  %v5582_v5 = vpop.f32.mrf.mxu0 }
 0x163   :  { %v646_v23 = vmul.f32 0.044715, %v582_v25  ;;  %v1011_v22 = vmul.f32 %v947_v12, %v5310_v34  ;;  %v773_v43 = vmul.f32 0.7978846, %v709_v60  ;;  %v520_v58 = vmul.f32 %v5568_v20, %v5568_v20 }
 0x164   :  { %v583_v26 = vmul.f32 %v519_v9, %v5557_v63  ;;  %v521_v41 = vmul.f32 %v5572_v16, %v5572_v16  ;;  %v888_v45 = vadd.f32 1.0, %v5477_v27  ;;  %v950_v3 = vmul.f32 0.5, %v886_v44 }
 0x165   :  { %v710_v35 = vadd.f32 %v646_v23, %v5541_v38  ;;  %v1063_v13 = vpack.c.bf16 %v1011_v22, %v1009_v59  ;;  %v584_v61 = vmul.f32 %v520_v58, %v5568_v20  ;;  %v5590_v60 = vadd.f32 %v5507_v47, %v5136_v55 }
 0x166   :  { %v647_v34 = vmul.f32 0.044715, %v583_v26  ;;  %v585_v11 = vmul.f32 %v521_v41, %v5572_v16  ;;  %v5592_v48 = vpop.eup %4793  ;;  %4803 = vtanh.f32 %v772_v4  ;;  %v952_v12 = vmul.f32 0.5, %v888_v45  ;;  %v5600_v26 = vpop.f32.mrf.mxu0 }
 0x167   :  { %v774_v25 = vmul.f32 0.7978846, %v710_v35  ;;  %1293 = vmatmul.mubr.bf16.gmra.mxu1 %v1063_v13  ;;  %v885_v9 = vadd.f32 1.0, %v5429_v36  ;;  %v5595_v23 = vpop.eup %4795  ;;  %v648_v59 = vmul.f32 0.044715, %v584_v61  ;;  %v522_v44 = vmul.f32 %v5590_v60, %v5590_v60 }
 0x168   :  { %v711_v27 = vadd.f32 %v647_v34, %v5557_v63  ;;  %v649_v22 = vmul.f32 0.044715, %v585_v11  ;;  %v1014_v47 = vmul.f32 %v950_v3, %v5342_v2  ;;  %v1016_v4 = vmul.f32 %v952_v12, %v5365_v19  ;;  %v5615_v3 = vpop.f32.mrf.mxu0 }
 0x169   :  { %v887_v58 = vadd.f32 1.0, %v5467_v14  ;;  %v949_v41 = vmul.f32 0.5, %v885_v9  ;;  %v5605_v35 = vpop.eup %4797  ;;  %4805 = vtanh.f32 %v773_v43  ;;  %v586_v13 = vmul.f32 %v522_v44, %v5590_v60 }
 0x16a   :  { %v775_v36 = vmul.f32 0.7978846, %v711_v27  ;;  %v712_v45 = vadd.f32 %v648_v59, %v5568_v20  ;;  %v1066_v34 = vpack.c.bf16 %v1016_v4, %v1014_v47  ;;  %v5611_v11 = vadd.f32 %v5518_v21, %v5133_v54 }
 0x16b   :  { %v951_v61 = vmul.f32 0.5, %v887_v58  ;;  %4807 = vtanh.f32 %v774_v25  ;;  %v713_v2 = vadd.f32 %v649_v22, %v5572_v16  ;;  %v650_v19 = vmul.f32 0.044715, %v586_v13 }
 0x16c   :  { %v1013_v14 = vmul.f32 %v949_v41, %v5323_v56  ;;  %v5617_v43 = vpop.eup %4799  ;;  %1300 = vmatprep.mubr.bf16.mxu1 %v1066_v34  ;;  %v523_v9 = vmul.f32 %v5611_v11, %v5611_v11  ;;  %v5624_v21 = vadd.f32 %v5530_v10, %v5136_v55  ;;  %v5628_v25 = vadd.f32 %v5535_v39, %v5133_v54 }
 0x16d   :  { %v1015_v12 = vmul.f32 %v951_v61, %v5359_v18  ;;  %v5630_v27 = vpop.eup %4801  ;;  %4809 = vtanh.f32 %v775_v36  ;;  %v714_v56 = vadd.f32 %v650_v19, %v5590_v60  ;;  %v890_v59 = vadd.f32 1.0, %v5499_v31  ;;  %v5640_v36 = vpop.f32.mrf.mxu0 }
 0x16e   :  { %v892_v18 = vadd.f32 1.0, %v5537_v37  ;;  %v776_v22 = vmul.f32 0.7978846, %v712_v45  ;;  %v587_v47 = vmul.f32 %v523_v9, %v5611_v11  ;;  %v524_v10 = vmul.f32 %v5624_v21, %v5624_v21 }
 0x16f   :  { %v1065_v44 = vpack.c.bf16 %v1015_v12, %v1013_v14  ;;  %v777_v4 = vmul.f32 0.7978846, %v713_v2  ;;  %v525_v39 = vmul.f32 %v5628_v25, %v5628_v25  ;;  %v954_v58 = vmul.f32 0.5, %v890_v59 }
 0x170   :  { %v956_v41 = vmul.f32 0.5, %v892_v18  ;;  %v651_v13 = vmul.f32 0.044715, %v587_v47  ;;  %v588_v31 = vmul.f32 %v524_v10, %v5624_v21  ;;  %v5645_v37 = vadd.f32 %v5546_v30, %v5136_v55 }
 0x171   :  { %1301 = vmatmul.mubr.bf16.gmra.mxu1 %v1065_v44  ;;  %v889_v45 = vadd.f32 1.0, %v5482_v62  ;;  %v778_v34 = vmul.f32 0.7978846, %v714_v56  ;;  %v589_v61 = vmul.f32 %v525_v39, %v5628_v25  ;;  %v1018_v2 = vmul.f32 %v954_v58, %v5385_v52  ;;  %v5661_v52 = vpop.f32.mrf.mxu0 }
 0x172   :  { %v1020_v19 = vmul.f32 %v956_v41, %v5412_v24  ;;  %v715_v14 = vadd.f32 %v651_v13, %v5611_v11  ;;  %v652_v12 = vmul.f32 0.044715, %v588_v31  ;;  %v526_v9 = vmul.f32 %v5645_v37, %v5645_v37 }
 0x173   :  { %v891_v59 = vadd.f32 1.0, %v5520_v46  ;;  %v5655_v18 = vpop.eup %4803  ;;  %v653_v30 = vmul.f32 0.044715, %v589_v61  ;;  %v953_v62 = vmul.f32 0.5, %v889_v45  ;;  %v5659_v56 = vadd.f32 %v5559_v57, %v5133_v54 }
 0x174   :  { %v1068_v44 = vpack.c.bf16 %v1020_v19, %v1018_v2  ;;  %4811 = vtanh.f32 %v776_v22  ;;  %v716_v24 = vadd.f32 %v652_v12, %v5624_v21  ;;  %v590_v47 = vmul.f32 %v526_v9, %v5645_v37 }
 0x175   :  { %v955_v10 = vmul.f32 0.5, %v891_v59  ;;  %4813 = vtanh.f32 %v777_v4  ;;  %v779_v39 = vmul.f32 0.7978846, %v715_v14  ;;  %v527_v46 = vmul.f32 %v5659_v56, %v5659_v56 }
 0x176   :  { %1308 = vmatprep.mubr.bf16.mxu1 %v1068_v44  ;;  %v5669_v58 = vadd.f32 %v5582_v5, %v5136_v55  ;;  %v5671_v57 = vpop.eup %4805  ;;  %v717_v41 = vadd.f32 %v653_v30, %v5628_v25  ;;  %v654_v22 = vmul.f32 0.044715, %v590_v47  ;;  %v1017_v13 = vmul.f32 %v953_v62, %v5371_v32  ;;  %v458_v5 = vpop.f32.mrf.mxu0 }
 0x177   :  { %v1019_v31 = vmul.f32 %v955_v10, %v5404_v33  ;;  %4815 = vtanh.f32 %v778_v34  ;;  %v591_v4 = vmul.f32 %v527_v46, %v5659_v56  ;;  %v5681_v61 = vadd.f32 %v5600_v26, %v5133_v54 }
 0x178   :  { %v528_v45 = vmul.f32 %v5669_v58, %v5669_v58  ;;  %v5683_v2 = vpop.eup %4807  ;;  %v780_v19 = vmul.f32 0.7978846, %v716_v24  ;;  %v718_v14 = vadd.f32 %v654_v22, %v5645_v37  ;;  %v894_v32 = vadd.f32 1.0, %v5561_v29 }
 0x179   :  { %v1067_v12 = vpack.c.bf16 %v1019_v31, %v1017_v13  ;;  %4817 = vtanh.f32 %v779_v39  ;;  %v655_v33 = vmul.f32 0.044715, %v591_v4  ;;  %v529_v9 = vmul.f32 %v5681_v61, %v5681_v61  ;;  %v460_v39 = vpop.f32.mrf.mxu0 }
 0x17a   :  { %v592_v34 = vmul.f32 %v528_v45, %v5669_v58  ;;  %v5690_v59 = vpop.eup %4809  ;;  %v781_v26 = vmul.f32 0.7978846, %v717_v41  ;;  %v896_v30 = vadd.f32 1.0, %v5595_v23  ;;  %v958_v44 = vmul.f32 0.5, %v894_v32 }
 0x17b   :  { %1309 = vmatmul.mubr.bf16.gmra.mxu1 %v1067_v12  ;;  %v5695_v62 = vadd.f32 %v5615_v3, %v5136_v55  ;;  %v719_v29 = vadd.f32 %v655_v33, %v5659_v56  ;;  %v593_v47 = vmul.f32 %v529_v9, %v5681_v61  ;;  %v893_v10 = vadd.f32 1.0, %v5552_v1  ;;  %v462_v32 = vpop.f32.mrf.mxu0 }
 0x17c   :  { %v656_v24 = vmul.f32 0.044715, %v592_v34  ;;  %4819 = vtanh.f32 %v780_v19  ;;  %v782_v46 = vmul.f32 0.7978846, %v718_v14  ;;  %v960_v22 = vmul.f32 0.5, %v896_v30 }
 0x17d   :  { %v530_v41 = vmul.f32 %v5695_v62, %v5695_v62  ;;  %v657_v13 = vmul.f32 0.044715, %v593_v47  ;;  %v1022_v3 = vmul.f32 %v958_v44, %v5434_v42  ;;  %v895_v31 = vadd.f32 1.0, %v5592_v48 }
 0x17e   :  { %v720_v23 = vadd.f32 %v656_v24, %v5669_v58  ;;  %v1024_v4 = vmul.f32 %v960_v22, %v5459_v6  ;;  %v957_v12 = vmul.f32 0.5, %v893_v10  ;;  %v5709_v1 = vadd.f32 %v5640_v36, %v5133_v54 }
 0x17f   :  { %v594_v45 = vmul.f32 %v530_v41, %v5695_v62  ;;  %4821 = vtanh.f32 %v781_v26  ;;  %v783_v19 = vmul.f32 0.7978846, %v719_v29  ;;  %v959_v14 = vmul.f32 0.5, %v895_v31 }
 0x180   :  { %4823 = vtanh.f32 %v782_v46  ;;  %v784_v33 = vmul.f32 0.7978846, %v720_v23  ;;  %v1070_v34 = vpack.c.bf16 %v1024_v4, %v1022_v3  ;;  %v531_v42 = vmul.f32 %v5709_v1, %v5709_v1 }
 0x181   :  { %v5713_v48 = vpop.eup %4811  ;;  %v721_v6 = vadd.f32 %v657_v13, %v5681_v61  ;;  %v1021_v9 = vmul.f32 %v957_v12, %v5415_v8  ;;  %v1023_v30 = vmul.f32 %v959_v14, %v5444_v0  ;;  %v5720_v36 = vadd.f32 %v5661_v52, %v5136_v55  ;;  %v464_v52 = vpop.f32.mrf.mxu0 }
 0x182   :  { %v5722_v26 = vpop.eup %4813  ;;  %1316 = vmatprep.mubr.bf16.mxu1 %v1070_v34  ;;  %v658_v44 = vmul.f32 0.044715, %v594_v45  ;;  %v595_v29 = vmul.f32 %v531_v42, %v5709_v1  ;;  %v5726_v24 = vadd.f32 %v458_v5, %v5133_v54  ;;  %v898_v47 = vadd.f32 1.0, %v5617_v43 }
 0x183   :  { %4825 = vtanh.f32 %v783_v19  ;;  %v1069_v10 = vpack.c.bf16 %v1023_v30, %v1021_v9  ;;  %v532_v8 = vmul.f32 %v5720_v36, %v5720_v36  ;;  %v900_v0 = vadd.f32 1.0, %v5655_v18  ;;  %v468_v34 = vpop.f32.mrf.mxu0 }
 0x184   :  { %v5732_v46 = vpop.eup %4815  ;;  %4827 = vtanh.f32 %v784_v33  ;;  %v659_v22 = vmul.f32 0.044715, %v595_v29  ;;  %v533_v41 = vmul.f32 %v5726_v24, %v5726_v24  ;;  %v962_v23 = vmul.f32 0.5, %v898_v47 }
 0x185   :  { %1317 = vmatmul.mubr.bf16.gmra.mxu1 %v1069_v10  ;;  %v596_v5 = vmul.f32 %v532_v8, %v5720_v36  ;;  %v964_v43 = vmul.f32 0.5, %v900_v0  ;;  %v5738_v13 = vadd.f32 %v460_v39, %v5136_v55  ;;  %v897_v3 = vadd.f32 1.0, %v5605_v35 }
 0x186   :  { %v5741_v31 = vpop.eup %4817  ;;  %v785_v18 = vmul.f32 0.7978846, %v721_v6  ;;  %v722_v4 = vadd.f32 %v658_v44, %v5695_v62  ;;  %v597_v45 = vmul.f32 %v533_v41, %v5726_v24  ;;  %v1026_v12 = vmul.f32 %v962_v23, %v5480_v17  ;;  %v470_v23 = vpop.f32.mrf.mxu0 }
 0x187   :  { %v660_v19 = vmul.f32 0.044715, %v596_v5  ;;  %v1028_v14 = vmul.f32 %v964_v43, %v5512_v40  ;;  %v534_v33 = vmul.f32 %v5738_v13, %v5738_v13  ;;  %v899_v39 = vadd.f32 1.0, %v5630_v27 }
 0x188   :  { %v723_v35 = vadd.f32 %v659_v22, %v5709_v1  ;;  %v661_v42 = vmul.f32 0.044715, %v597_v45  ;;  %v961_v9 = vmul.f32 0.5, %v897_v3  ;;  %v5752_v6 = vadd.f32 %v462_v32, %v5133_v54 }
 0x189   :  { %v5754_v30 = vpop.eup %4819  ;;  %v724_v17 = vadd.f32 %v660_v19, %v5720_v36  ;;  %v1072_v44 = vpack.c.bf16 %v1028_v14, %v1026_v12  ;;  %v598_v40 = vmul.f32 %v534_v33, %v5738_v13  ;;  %v963_v29 = vmul.f32 0.5, %v899_v39 }
 0x18a   :  { %v786_v47 = vmul.f32 0.7978846, %v722_v4  ;;  %v725_v10 = vadd.f32 %v661_v42, %v5726_v24  ;;  %v1025_v27 = vmul.f32 %v961_v9, %v5462_v28  ;;  %v535_v8 = vmul.f32 %v5752_v6, %v5752_v6 }
 0x18b   :  { %v788_v0 = vmul.f32 0.7978846, %v724_v17  ;;  %1324 = vmatprep.mubr.bf16.mxu1 %v1072_v44  ;;  %v662_v32 = vmul.f32 0.044715, %v598_v40  ;;  %v1027_v22 = vmul.f32 %v963_v29, %v5495_v15  ;;  %v5764_v41 = vadd.f32 %v464_v52, %v5136_v55 }
 0x18c   :  { %v5766_v5 = vpop.eup %4821  ;;  %4829 = vtanh.f32 %v785_v18  ;;  %v599_v43 = vmul.f32 %v535_v8, %v5752_v6  ;;  %v5770_v3 = vadd.f32 %v468_v34, %v5133_v54  ;;  %v902_v28 = vadd.f32 1.0, %v5683_v2  ;;  %v472_v34 = vpop.f32.mrf.mxu0 }
 0x18d   :  { %v5773_v4 = vpop.eup %4823  ;;  %v787_v45 = vmul.f32 0.7978846, %v723_v35  ;;  %v726_v12 = vadd.f32 %v662_v32, %v5738_v13  ;;  %v1071_v15 = vpack.c.bf16 %v1027_v22, %v1025_v27  ;;  %v536_v52 = vmul.f32 %v5764_v41, %v5764_v41 }
 0x18e   :  { %4831 = vtanh.f32 %v786_v47  ;;  %v789_v19 = vmul.f32 0.7978846, %v725_v10  ;;  %v663_v14 = vmul.f32 0.044715, %v599_v43  ;;  %v904_v18 = vadd.f32 1.0, %v5713_v48 }
 0x18f   :  { %4833 = vtanh.f32 %v788_v0  ;;  %1325 = vmatmul.mubr.bf16.gmra.mxu1 %v1071_v15  ;;  %v600_v33 = vmul.f32 %v536_v52, %v5764_v41  ;;  %v966_v39 = vmul.f32 0.5, %v902_v28  ;;  %v5781_v2 = vadd.f32 %v470_v23, %v5136_v55  ;;  %v474_v23 = vpop.f32.mrf.mxu0 }
 0x190   :  { %v5783_v35 = vpop.eup %4825  ;;  %v790_v42 = vmul.f32 0.7978846, %v726_v12  ;;  %v537_v9 = vmul.f32 %v5770_v3, %v5770_v3  ;;  %v968_v17 = vmul.f32 0.5, %v904_v18  ;;  %v901_v44 = vadd.f32 1.0, %v5671_v57 }
 0x191   :  { %v4828_v40 = vpop.eup %4827  ;;  %4835 = vtanh.f32 %v787_v45  ;;  %v727_v48 = vadd.f32 %v663_v14, %v5752_v6  ;;  %v664_v29 = vmul.f32 0.044715, %v600_v33  ;;  %v538_v47 = vmul.f32 %v5781_v2, %v5781_v2 }
 0x192   :  { %4837 = vtanh.f32 %v789_v19  ;;  %v1030_v10 = vmul.f32 %v966_v39, %v5541_v38  ;;  %v1032_v27 = vmul.f32 %v968_v17, %v5568_v20  ;;  %v903_v8 = vadd.f32 1.0, %v5690_v59 }
 0x193   :  { %v728_v0 = vadd.f32 %v664_v29, %v5764_v41  ;;  %v602_v32 = vmul.f32 %v538_v47, %v5781_v2  ;;  %v965_v57 = vmul.f32 0.5, %v901_v44  ;;  %v5797_v22 = vadd.f32 %v472_v34, %v5133_v54 }
 0x194   :  { %4839 = vtanh.f32 %v790_v42  ;;  %v601_v43 = vmul.f32 %v537_v9, %v5770_v3  ;;  %v1074_v28 = vpack.c.bf16 %v1032_v27, %v1030_v10  ;;  %v967_v45 = vmul.f32 0.5, %v903_v8 }
 0x195   :  { %v791_v12 = vmul.f32 0.7978846, %v727_v48  ;;  %v792_v38 = vmul.f32 0.7978846, %v728_v0  ;;  %v666_v15 = vmul.f32 0.044715, %v602_v32  ;;  %v539_v20 = vmul.f32 %v5797_v22, %v5797_v22 }
 0x196   :  { %1332 = vmatprep.mubr.bf16.mxu1 %v1074_v28  ;;  %v1029_v59 = vmul.f32 %v965_v57, %v5516_v7  ;;  %v1031_v52 = vmul.f32 %v967_v45, %v5557_v63  ;;  %v5805_v54 = vadd.f32 %v474_v23, %v5136_v55  ;;  %v906_v19 = vadd.f32 1.0, %v5732_v46 }
 0x197   :  { %4841 = vtanh.f32 %v792_v38  ;;  %v730_v14 = vadd.f32 %v666_v15, %v5781_v2  ;;  %v603_v18 = vmul.f32 %v539_v20, %v5797_v22  ;;  %v908_v33 = vadd.f32 1.0, %v5754_v30 }
 0x198   :  { %v665_v39 = vmul.f32 0.044715, %v601_v43  ;;  %v1073_v34 = vpack.c.bf16 %v1031_v52, %v1029_v59  ;;  %v540_v42 = vmul.f32 %v5805_v54, %v5805_v54  ;;  %v970_v7 = vmul.f32 0.5, %v906_v19 }
 0x199   :  { %v4830_v9 = vpop.eup %4829  ;;  %v794_v63 = vmul.f32 0.7978846, %v730_v14  ;;  %v667_v17 = vmul.f32 0.044715, %v603_v18  ;;  %v972_v55 = vmul.f32 0.5, %v908_v33  ;;  %v905_v44 = vadd.f32 1.0, %v5722_v26 }
 0x19a   :  { %4843 = vtanh.f32 %v791_v12  ;;  %1333 = vmatmul.mubr.bf16.gmra.mxu1 %v1073_v34  ;;  %v604_v46 = vmul.f32 %v540_v42, %v5805_v54  ;;  %v907_v48 = vadd.f32 1.0, %v5741_v31  ;;  %v910_v30 = vadd.f32 1.0, %v5773_v4 }
 0x19b   :  { %v4832_v29 = vpop.eup %4831  ;;  %v731_v47 = vadd.f32 %v667_v17, %v5797_v22  ;;  %v1034_v10 = vmul.f32 %v970_v7, %v5590_v60  ;;  %v1036_v27 = vmul.f32 %v972_v55, %v5624_v21  ;;  %v969_v8 = vmul.f32 0.5, %v905_v44 }
 0x19c   :  { %v4834_v0 = vpop.eup %4833  ;;  %v668_v32 = vmul.f32 0.044715, %v604_v46  ;;  %v971_v57 = vmul.f32 0.5, %v907_v48  ;;  %v912_v26 = vadd.f32 1.0, %v4828_v40  ;;  %v974_v23 = vmul.f32 0.5, %v910_v30 }
 0x19d   :  { %v729_v43 = vadd.f32 %v665_v39, %v5770_v3  ;;  %4845 = vtanh.f32 %v794_v63  ;;  %v1076_v28 = vpack.c.bf16 %v1036_v27, %v1034_v10  ;;  %v1033_v31 = vmul.f32 %v969_v8, %v5572_v16 }
 0x19e   :  { %v4836_v4 = vpop.eup %4835  ;;  %v732_v45 = vadd.f32 %v668_v32, %v5805_v54  ;;  %v1035_v12 = vmul.f32 %v971_v57, %v5611_v11  ;;  %v976_v60 = vmul.f32 0.5, %v912_v26  ;;  %v909_v21 = vadd.f32 1.0, %v5766_v5 }
 0x19f   :  { %v4838_v38 = vpop.eup %4837  ;;  %v795_v15 = vmul.f32 0.7978846, %v731_v47  ;;  %1340 = vmatprep.mubr.bf16.mxu1 %v1076_v28  ;;  %v1038_v40 = vmul.f32 %v974_v23, %v5645_v37  ;;  %v911_v20 = vadd.f32 1.0, %v5783_v35  ;;  %v914_v59 = vadd.f32 1.0, %v4832_v29 }
 0x1a0   :  { %v796_v52 = vmul.f32 0.7978846, %v732_v45  ;;  %v1075_v19 = vpack.c.bf16 %v1035_v12, %v1033_v31  ;;  %v1040_v16 = vmul.f32 %v976_v60, %v5669_v58  ;;  %v916_v14 = vadd.f32 1.0, %v4834_v0 }
 0x1a1   :  { %v4840_v18 = vpop.eup %4839  ;;  %v793_v33 = vmul.f32 0.7978846, %v729_v43  ;;  %v975_v39 = vmul.f32 0.5, %v911_v20  ;;  %v978_v11 = vmul.f32 0.5, %v914_v59  ;;  %v973_v34 = vmul.f32 0.5, %v909_v21 }
 0x1a2   :  { %4847 = vtanh.f32 %v796_v52  ;;  %1341 = vmatmul.mubr.bf16.gmra.mxu1 %v1075_v19  ;;  %v1078_v5 = vpack.c.bf16 %v1040_v16, %v1038_v40  ;;  %v980_v42 = vmul.f32 0.5, %v916_v14  ;;  %v915_v63 = vadd.f32 1.0, %v4836_v4 }
 0x1a3   :  { %4849 = vtanh.f32 %v795_v15  ;;  %v1039_v37 = vmul.f32 %v975_v39, %v5659_v56  ;;  %v1042_v58 = vmul.f32 %v978_v11, %v5695_v62  ;;  %v918_v17 = vadd.f32 1.0, %v4840_v18 }
 0x1a4   :  { %v4842_v7 = vpop.eup %4841  ;;  %1348 = vmatprep.mubr.bf16.mxu1 %v1078_v5  ;;  %v1044_v35 = vmul.f32 %v980_v42, %v5720_v36  ;;  %4851 = vtanh.f32 %v793_v33  ;;  %v1037_v44 = vmul.f32 %v973_v34, %v5628_v25  ;;  %v913_v46 = vadd.f32 1.0, %v4830_v9  ;;  %v5848_v34 = vld [vmem:[#allocation4] ss:$0 sm:$0xff] }
 0x1a5   :  { %v920_v55 = vadd.f32 1.0, %v4842_v7  ;;  %v979_v10 = vmul.f32 0.5, %v915_v63  ;;  %v982_v27 = vmul.f32 0.5, %v918_v17  ;;  %v917_v9 = vadd.f32 1.0, %v4838_v38 }
 0x1a6   :  { %v1080_v30 = vpack.c.bf16 %v1044_v35, %v1042_v58  ;;  %v1077_v47 = vpack.c.bf16 %v1039_v37, %v1037_v44  ;;  %v977_v56 = vmul.f32 0.5, %v913_v46  ;;  %v4854_v44 = vld [vmem:[%s6610_s0 + $0x8] sm:$0xff]  }
 0x1a7   :  { %v4844_v48 = vpop.eup %4843  ;;  %v984_v29 = vmul.f32 0.5, %v920_v55  ;;  %v1043_v62 = vmul.f32 %v979_v10, %v5709_v1  ;;  %v1046_v32 = vmul.f32 %v982_v27, %v5738_v13  ;;  %v981_v12 = vmul.f32 0.5, %v917_v9 }
 0x1a8   :  { %v919_v0 = vadd.f32 1.0, %v4844_v48  ;;  %v1041_v25 = vmul.f32 %v977_v56, %v5681_v61  ;;  %v1383_v46 = vunpack.c.l.bf16 %v4854_v44  ;;  %v1384_v27 = vunpack.c.h.bf16 %v4854_v44 }
 0x1a9   :  { %v1048_v36 = vmul.f32 %v984_v29, %v5764_v41  ;;  %v1045_v38 = vmul.f32 %v981_v12, %v5726_v24  ;;  %v4853_v24 = vld [vmem:[%s6610_s0] sm:$0xff]  }
 0x1aa   :  { %v4846_v8 = vpop.eup %4845  ;;  %1349 = vmatmul.mubr.bf16.gmra.mxu1 %v1077_v47  ;;  %v1079_v43 = vpack.c.bf16 %v1043_v62, %v1041_v25  ;;  %v983_v28 = vmul.f32 0.5, %v919_v0  ;;  %v1381_v33 = vunpack.c.l.bf16 %v4853_v24  ;;  %v1382_v42 = vunpack.c.h.bf16 %v4853_v24  ;;  %v4855_v25 = vld [vmem:[%s6610_s0 + $0x10] sm:$0xff]  }
 0x1ab   :  { %1356 = vmatprep.mubr.bf16.mxu1 %v1080_v30  ;;  %v922_v57 = vadd.f32 1.0, %v4846_v8  ;;  %v1082_v23 = vpack.c.bf16 %v1048_v36, %v1046_v32  ;;  %v1385_v9 = vunpack.c.l.bf16 %v4855_v25 }
 0x1ac   :  { %v1047_v1 = vmul.f32 %v983_v28, %v5752_v6 }
 0x1ad   :  { %v986_v45 = vmul.f32 0.5, %v922_v57 }
 0x1ae   :  { %v1081_v20 = vpack.c.bf16 %v1047_v1, %v1045_v38 }
 0x1af   :  { %v4848_v26 = vpop.eup %4847  ;;  %v1050_v61 = vmul.f32 %v986_v45, %v5781_v2 }
 0x1b0   :  { %v924_v31 = vadd.f32 1.0, %v4848_v26  ;;  %v4850_v4 = vpop.eup %4849 }
 0x1b1   :  { %v4852_v41 = vpop.eup %4851  ;;  %v923_v21 = vadd.f32 1.0, %v4850_v4  ;;  %v1386_v4 = vunpack.c.h.bf16 %v4855_v25 }
 0x1b2   :  { %1357 = vmatmul.mubr.bf16.gmra.mxu1 %v1079_v43  ;;  %v988_v60 = vmul.f32 0.5, %v924_v31  ;;  %v921_v15 = vadd.f32 1.0, %v4852_v41 }
 0x1b3   :  { %1364 = vmatprep.mubr.bf16.mxu1 %v1082_v23  ;;  %v987_v59 = vmul.f32 0.5, %v923_v21 }
 0x1b4   :  { %v1052_v13 = vmul.f32 %v988_v60, %v5805_v54  ;;  %v985_v52 = vmul.f32 0.5, %v921_v15  ;;  %v5842_v54 = vld [vmem:[#allocation2] ss:$0 sm:$0xff] }
 0x1b5   :  { %v1051_v19 = vmul.f32 %v987_v59, %v5797_v22 }
 0x1b6   :  { %v1084_v40 = vpack.c.bf16 %v1052_v13, %v1050_v61  ;;  %v1049_v16 = vmul.f32 %v985_v52, %v5770_v3  ;;  %v4856_v61 = vld [vmem:[%s6610_s0 + $0x18] sm:$0xff]  }
 0x1b7   :  { %v1387_v38 = vunpack.c.l.bf16 %v4856_v61 }
 0x1b8   :  { %v1083_v14 = vpack.c.bf16 %v1051_v19, %v1049_v16  ;;  %v1388_v19 = vunpack.c.h.bf16 %v4856_v61 }
 0x1ba   :  { %1365 = vmatmul.mubr.bf16.gmra.mxu1 %v1081_v20 }
 0x1bb   :  { %1372 = vmatprep.mubr.bf16.mxu1 %v1084_v40 }
 0x1c2   :  { %1373 = vmatmul.mubr.bf16.gmra.mxu1 %v1083_v14 }
 0x1f0   :  { %v4551_v6 = vpop.f32.mrf.mxu1 }
 0x1f2   :  { %v4552_v18 = vpop.f32.mrf.mxu1 }
 0x1f3   :  { %v4553_v2 = vadd.f32 %v4552_v18, %v4551_v6 }
 0x1f4   :  { %v4554_v39 = vpop.f32.mrf.mxu1 }
 0x1f5   :  { %v1255_v11 = vadd.f32 %v4553_v2, %v5842_v54 }
 0x1f6   :  { %v4555_v5 = vpop.f32.mrf.mxu1 }
 0x1f7   :  { %v4556_v22 = vadd.f32 %v4555_v5, %v4554_v39  ;;  %v1413_v3 = vadd.f32 %v1381_v33, %v1255_v11  ;;  %v4857_v39 = vld [vmem:[%s6610_s0 + $0x20] sm:$0xff]  }
 0x1f8   :  { %v1389_v11 = vunpack.c.l.bf16 %v4857_v39 }
 0x1f9   :  { %v1258_v7 = vadd.f32 %v4556_v22, %v5842_v54  ;;  %v1452_v37 = vmul.f32 %v5848_v34, %v1413_v3 }
 0x1fb   :  { %1484 = vadd.xlane.f32.xlu0 %v1452_v37  ;;  %v1414_v35 = vadd.f32 %v1382_v42, %v1258_v7  ;;  %v1390_v37 = vunpack.c.h.bf16 %v4857_v39 }
 0x1fd   :  { %v4557_v63 = vpop.f32.mrf.mxu1  ;;  %v1453_v58 = vmul.f32 %v5848_v34, %v1414_v35 }
 0x1ff   :  { %v4558_v17 = vpop.f32.mrf.mxu1  ;;  %1486 = vadd.xlane.f32.xlu0 %v1453_v58 }
 0x200   :  { %v4559_v55 = vadd.f32 %v4558_v17, %v4557_v63 }
 0x201   :  { %v4560_v48 = vpop.f32.mrf.mxu1 }
 0x202   :  { %v1263_v30 = vadd.f32 %v4559_v55, %v5842_v54 }
 0x203   :  { %v4561_v29 = vpop.f32.mrf.mxu1 }
 0x204   :  { %v4562_v47 = vadd.f32 %v4561_v29, %v4560_v48  ;;  %v1415_v10 = vadd.f32 %v1383_v46, %v1263_v30  ;;  %v4858_v48 = vld [vmem:[%s6610_s0 + $0x28] sm:$0xff]  }
 0x205   :  { %v1391_v30 = vunpack.c.l.bf16 %v4858_v48 }
 0x206   :  { %v1266_v8 = vadd.f32 %v4562_v47, %v5842_v54  ;;  %v1454_v56 = vmul.f32 %v5848_v34, %v1415_v10 }
 0x207   :  { %v4563_v36 = vpop.f32.mrf.mxu1 }
 0x208   :  { %1488 = vadd.xlane.f32.xlu1 %v1454_v56  ;;  %v1416_v62 = vadd.f32 %v1384_v27, %v1266_v8  ;;  %v1392_v56 = vunpack.c.h.bf16 %v4858_v48 }
 0x209   :  { %v4564_v0 = vpop.f32.mrf.mxu1 }
 0x20a   :  { %v4565_v32 = vadd.f32 %v4564_v0, %v4563_v36  ;;  %v1455_v57 = vmul.f32 %v5848_v34, %v1416_v62 }
 0x20b   :  { %v4566_v26 = vpop.f32.mrf.mxu1 }
 0x20c   :  { %v1271_v23 = vadd.f32 %v4565_v32, %v5842_v54  ;;  %1490 = vadd.xlane.f32.xlu1 %v1455_v57 }
 0x20d   :  { %v4567_v43 = vpop.f32.mrf.mxu1 }
 0x20e   :  { %v4568_v28 = vadd.f32 %v4567_v43, %v4566_v26  ;;  %v1417_v31 = vadd.f32 %v1385_v9, %v1271_v23  ;;  %v4859_v26 = vld [vmem:[%s6610_s0 + $0x30] sm:$0xff]  }
 0x20f   :  { %v1393_v23 = vunpack.c.l.bf16 %v4859_v26 }
 0x210   :  { %v1274_v45 = vadd.f32 %v4568_v28, %v5842_v54  ;;  %v1456_v12 = vmul.f32 %v5848_v34, %v1417_v31 }
 0x211   :  { %v4569_v60 = vpop.f32.mrf.mxu1 }
 0x212   :  { %1492 = vadd.xlane.f32.xlu0 %v1456_v12  ;;  %v1418_v41 = vadd.f32 %v1386_v4, %v1274_v45  ;;  %v1394_v12 = vunpack.c.h.bf16 %v4859_v26 }
 0x213   :  { %v4570_v1 = vpop.f32.mrf.mxu1 }
 0x214   :  { %v4571_v13 = vadd.f32 %v4570_v1, %v4569_v60  ;;  %v1457_v21 = vmul.f32 %v5848_v34, %v1418_v41 }
 0x215   :  { %v4572_v15 = vpop.f32.mrf.mxu1 }
 0x216   :  { %v1279_v40 = vadd.f32 %v4571_v13, %v5842_v54  ;;  %1494 = vadd.xlane.f32.xlu1 %v1457_v21 }
 0x217   :  { %v4573_v20 = vpop.f32.mrf.mxu1 }
 0x218   :  { %v4574_v59 = vadd.f32 %v4573_v20, %v4572_v15  ;;  %v1419_v52 = vadd.f32 %v1387_v38, %v1279_v40  ;;  %v4860_v15 = vld [vmem:[%s6610_s0 + $0x38] sm:$0xff]  }
 0x219   :  { %v1395_v40 = vunpack.c.l.bf16 %v4860_v15 }
 0x21a   :  { %v1282_v16 = vadd.f32 %v4574_v59, %v5842_v54  ;;  %v1458_v14 = vmul.f32 %v5848_v34, %v1419_v52 }
 0x21c   :  { %1496 = vadd.xlane.f32.xlu0 %v1458_v14  ;;  %v1420_v6 = vadd.f32 %v1388_v19, %v1282_v16  ;;  %v1396_v14 = vunpack.c.h.bf16 %v4860_v15 }
 0x21d   :  { %v4575_v18 = vpop.f32.mrf.mxu1 }
 0x21e   :  { %v1459_v2 = vmul.f32 %v5848_v34, %v1420_v6 }
 0x21f   :  { %v4576_v24 = vpop.f32.mrf.mxu1 }
 0x220   :  { %v4577_v33 = vadd.f32 %v4576_v24, %v4575_v18  ;;  %1498 = vadd.xlane.f32.xlu1 %v1459_v2 }
 0x221   :  { %v4578_v5 = vpop.f32.mrf.mxu1 }
 0x222   :  { %v1287_v22 = vadd.f32 %v4577_v33, %v5842_v54 }
 0x223   :  { %v4579_v3 = vpop.f32.mrf.mxu1 }
 0x224   :  { %v4580_v42 = vadd.f32 %v4579_v3, %v4578_v5  ;;  %v1421_v7 = vadd.f32 %v1389_v11, %v1287_v22  ;;  %v4861_v5 = vld [vmem:[%s6610_s0 + $0x40] sm:$0xff]  }
 0x225   :  { %v1397_v22 = vunpack.c.l.bf16 %v4861_v5 }
 0x226   :  { %v1290_v35 = vadd.f32 %v4580_v42, %v5842_v54  ;;  %v1460_v63 = vmul.f32 %v5848_v34, %v1421_v7 }
 0x227   :  { %v4581_v58 = vpop.f32.mrf.mxu1 }
 0x228   :  { %1500 = vadd.xlane.f32.xlu0 %v1460_v63  ;;  %v1422_v17 = vadd.f32 %v1390_v37, %v1290_v35  ;;  %v1398_v63 = vunpack.c.h.bf16 %v4861_v5 }
 0x229   :  { %v4582_v55 = vpop.f32.mrf.mxu1 }
 0x22a   :  { %v4583_v44 = vadd.f32 %v4582_v55, %v4581_v58  ;;  %v1461_v46 = vmul.f32 %v5848_v34, %v1422_v17 }
 0x22b   :  { %v4584_v29 = vpop.f32.mrf.mxu1 }
 0x22c   :  { %v1295_v47 = vadd.f32 %v4583_v44, %v5842_v54  ;;  %1502 = vadd.xlane.f32.xlu1 %v1461_v46 }
 0x22d   :  { %v4585_v10 = vpop.f32.mrf.mxu1 }
 0x22e   :  { %v4586_v27 = vadd.f32 %v4585_v10, %v4584_v29  ;;  %v1423_v8 = vadd.f32 %v1391_v30, %v1295_v47  ;;  %v4862_v29 = vld [vmem:[%s6610_s0 + $0x48] sm:$0xff]  }
 0x22f   :  { %v1399_v47 = vunpack.c.l.bf16 %v4862_v29 }
 0x230   :  { %v1298_v36 = vadd.f32 %v4586_v27, %v5842_v54  ;;  %v1462_v62 = vmul.f32 %v5848_v34, %v1423_v8 }
 0x231   :  { %v4587_v0 = vpop.f32.mrf.mxu1 }
 0x232   :  { %1504 = vadd.xlane.f32.xlu0 %v1462_v62  ;;  %v1424_v32 = vadd.f32 %v1392_v56, %v1298_v36  ;;  %v1400_v62 = vunpack.c.h.bf16 %v4862_v29 }
 0x233   :  { %v4588_v57 = vpop.f32.mrf.mxu1 }
 0x234   :  { %v4589_v25 = vadd.f32 %v4588_v57, %v4587_v0  ;;  %v1463_v9 = vmul.f32 %v5848_v34, %v1424_v32 }
 0x235   :  { %v4590_v43 = vpop.f32.mrf.mxu1 }
 0x236   :  { %v1303_v28 = vadd.f32 %v4589_v25, %v5842_v54  ;;  %1506 = vadd.xlane.f32.xlu1 %v1463_v9 }
 0x237   :  { %v4591_v31 = vpop.f32.mrf.mxu1 }
 0x238   :  { %v4592_v4 = vadd.f32 %v4591_v31, %v4590_v43  ;;  %v1425_v45 = vadd.f32 %v1393_v23, %v1303_v28  ;;  %v4863_v43 = vld [vmem:[%s6610_s0 + $0x50] sm:$0xff]  }
 0x239   :  { %v1401_v28 = vunpack.c.l.bf16 %v4863_v43 }
 0x23a   :  { %v1306_v60 = vadd.f32 %v4592_v4, %v5842_v54  ;;  %v1464_v41 = vmul.f32 %v5848_v34, %v1425_v45 }
 0x23b   :  { %v4593_v1 = vpop.f32.mrf.mxu1 }
 0x23c   :  { %1508 = vadd.xlane.f32.xlu0 %v1464_v41  ;;  %v1426_v13 = vadd.f32 %v1394_v12, %v1306_v60  ;;  %v1402_v41 = vunpack.c.h.bf16 %v4863_v43 }
 0x23d   :  { %v4594_v21 = vpop.f32.mrf.mxu1 }
 0x23e   :  { %v4595_v61 = vadd.f32 %v4594_v21, %v4593_v1  ;;  %v1465_v38 = vmul.f32 %v5848_v34, %v1426_v13 }
 0x23f   :  { %v4596_v20 = vpop.f32.mrf.mxu1 }
 0x240   :  { %v1311_v59 = vadd.f32 %v4595_v61, %v5842_v54  ;;  %1510 = vadd.xlane.f32.xlu1 %v1465_v38 }
 0x241   :  { %v4597_v52 = vpop.f32.mrf.mxu1 }
 0x242   :  { %v4598_v19 = vadd.f32 %v4597_v52, %v4596_v20  ;;  %v1427_v16 = vadd.f32 %v1395_v40, %v1311_v59  ;;  %v4864_v40 = vld [vmem:[%s6610_s0 + $0x58] sm:$0xff]  }
 0x243   :  { %v1403_v20 = vunpack.c.l.bf16 %v4864_v40 }
 0x244   :  { %v1314_v6 = vadd.f32 %v4598_v19, %v5842_v54  ;;  %v1466_v18 = vmul.f32 %v5848_v34, %v1427_v16 }
 0x245   :  { %v4599_v2 = vpop.f32.mrf.mxu1 }
 0x246   :  { %1512 = vadd.xlane.f32.xlu0 %v1466_v18  ;;  %v1428_v24 = vadd.f32 %v1396_v14, %v1314_v6  ;;  %v1404_v18 = vunpack.c.h.bf16 %v4864_v40 }
 0x247   :  { %v4600_v33 = vpop.f32.mrf.mxu1 }
 0x248   :  { %v1467_v39 = vmul.f32 %v5848_v34, %v1428_v24  ;;  %v4601_v11 = vadd.f32 %v4600_v33, %v4599_v2 }
 0x249   :  { %v4602_v3 = vpop.f32.mrf.mxu1 }
 0x24a   :  { %1514 = vadd.xlane.f32.xlu1 %v1467_v39  ;;  %v1319_v42 = vadd.f32 %v4601_v11, %v5842_v54 }
 0x24b   :  { %v4603_v7 = vpop.f32.mrf.mxu1 }
 0x24c   :  { %v4604_v37 = vadd.f32 %v4603_v7, %v4602_v3  ;;  %v1429_v35 = vadd.f32 %v1397_v22, %v1319_v42  ;;  %v4865_v22 = vld [vmem:[%s6610_s0 + $0x60] sm:$0xff]  }
 0x24d   :  { %v1405_v3 = vunpack.c.l.bf16 %v4865_v22 }
 0x24e   :  { %v1322_v58 = vadd.f32 %v4604_v37, %v5842_v54  ;;  %v1468_v17 = vmul.f32 %v5848_v34, %v1429_v35 }
 0x24f   :  { %v4605_v55 = vpop.f32.mrf.mxu1 }
 0x250   :  { %1516 = vadd.xlane.f32.xlu0 %v1468_v17  ;;  %v1430_v44 = vadd.f32 %v1398_v63, %v1322_v58  ;;  %v1406_v17 = vunpack.c.h.bf16 %v4865_v22 }
 0x251   :  { %v4606_v46 = vpop.f32.mrf.mxu1 }
 0x252   :  { %v4607_v48 = vadd.f32 %v4606_v46, %v4605_v55  ;;  %v1469_v30 = vmul.f32 %v5848_v34, %v1430_v44 }
 0x253   :  { %v4608_v10 = vpop.f32.mrf.mxu1 }
 0x254   :  { %v1327_v27 = vadd.f32 %v4607_v48, %v5842_v54  ;;  %1518 = vadd.xlane.f32.xlu1 %v1469_v30 }
 0x255   :  { %v4609_v8 = vpop.f32.mrf.mxu1 }
 0x256   :  { %v4610_v56 = vadd.f32 %v4609_v8, %v4608_v10  ;;  %v1431_v36 = vadd.f32 %v1399_v47, %v1327_v27  ;;  %v4866_v47 = vld [vmem:[%s6610_s0 + $0x68] sm:$0xff]  }
 0x257   :  { %v1407_v10 = vunpack.c.l.bf16 %v4866_v47 }
 0x258   :  { %v1330_v0 = vadd.f32 %v4610_v56, %v5842_v54  ;;  %v1470_v32 = vmul.f32 %v5848_v34, %v1431_v36 }
 0x25a   :  { %v4611_v57 = vpop.f32.mrf.mxu1  ;;  %1520 = vadd.xlane.f32.xlu0 %v1470_v32  ;;  %v1432_v25 = vadd.f32 %v1400_v62, %v1330_v0  ;;  %v1408_v32 = vunpack.c.h.bf16 %v4866_v47 }
 0x25c   :  { %v4612_v9 = vpop.f32.mrf.mxu1  ;;  %v1471_v26 = vmul.f32 %v5848_v34, %v1432_v25 }
 0x25d   :  { %v4613_v23 = vadd.f32 %v4612_v9, %v4611_v57 }
 0x25e   :  { %v4614_v31 = vpop.f32.mrf.mxu1  ;;  %1522 = vadd.xlane.f32.xlu1 %v1471_v26  ;;  %v4916_v26 = vmov 1966171168  }
 0x25f   :  { %v1335_v4 = vadd.f32 %v4613_v23, %v5842_v54  ;;  %v2609_v23 = vunpack.c.l.s4 %v4916_v26 }
 0x260   :  { %v4615_v45 = vpop.f32.mrf.mxu1 }
 0x261   :  { %v4616_v12 = vadd.f32 %v4615_v45, %v4614_v31  ;;  %v1433_v60 = vadd.f32 %v1401_v28, %v1335_v4  ;;  %v4867_v4 = vld [vmem:[%s6610_s0 + $0x70] sm:$0xff]  }
 0x262   :  { %v4617_v1 = vpop.f32.mrf.mxu1  ;;  %v1409_v45 = vunpack.c.l.bf16 %v4867_v4 }
 0x263   :  { %v1338_v13 = vadd.f32 %v4616_v12, %v5842_v54  ;;  %v1472_v21 = vmul.f32 %v5848_v34, %v1433_v60 }
 0x264   :  { %v4618_v61 = vpop.f32.mrf.mxu1 }
 0x265   :  { %v4619_v38 = vadd.f32 %v4618_v61, %v4617_v1  ;;  %1524 = vadd.xlane.f32.xlu0 %v1472_v21  ;;  %v1434_v15 = vadd.f32 %v1402_v41, %v1338_v13  ;;  %v2610_v1 = vunpack.c.0.s8 %v2609_v23  ;;  %v1410_v21 = vunpack.c.h.bf16 %v4867_v4 }
 0x266   :  { %v4620_v59 = vpop.f32.mrf.mxu1  ;;  %v5949_v61 = vsub.s32 2, %v5121_v50 }
 0x267   :  { %v1343_v52 = vadd.f32 %v4619_v38, %v5842_v54  ;;  %v1473_v19 = vmul.f32 %v5848_v34, %v1434_v15  ;;  %v5952_v38 = vsub.s32 3, %v5121_v50 }
 0x268   :  { %v4621_v16 = vpop.f32.mrf.mxu1 }
 0x269   :  { %v4622_v14 = vadd.f32 %v4621_v16, %v4620_v59  ;;  %1526 = vadd.xlane.f32.xlu1 %v1473_v19  ;;  %v1435_v6 = vadd.f32 %v1403_v20, %v1343_v52  ;;  %v5955_v20 = vsub.s32 4, %v5121_v50  ;;  %v5958_v59 = vsub.s32 5, %v5121_v50 }
 0x26a   :  { %v4623_v2 = vpop.f32.mrf.mxu1  ;;  %v5961_v19 = vsub.s32 6, %v5121_v50  ;;  %v5964_v16 = vsub.s32 7, %v5121_v50 }
 0x26b   :  { %v1346_v24 = vadd.f32 %v4622_v14, %v5842_v54  ;;  %v1474_v33 = vmul.f32 %v5848_v34, %v1435_v6 }
 0x26c   :  { %v4624_v39 = vpop.f32.mrf.mxu1 }
 0x26d   :  { %v4625_v11 = vadd.f32 %v4624_v39, %v4623_v2  ;;  %1528 = vadd.xlane.f32.xlu0 %v1474_v33  ;;  %v1436_v5 = vadd.f32 %v1404_v18, %v1346_v24  ;;  %v4868_v18 = vld [vmem:[%s6610_s0 + $0x78] sm:$0xff]   ;;  %v5972_v33 = vsub.s32 %v2610_v1, %v5121_v50 }
 0x26e   :  { %v4626_v42 = vpop.f32.mrf.mxu1  ;;  %v1411_v2 = vunpack.c.l.bf16 %v4868_v18  ;;  %v1412_v47 = vunpack.c.h.bf16 %v4868_v18 }
 0x26f   :  { %v1351_v7 = vadd.f32 %v4625_v11, %v5842_v54  ;;  %v1475_v37 = vmul.f32 %v5848_v34, %v1436_v5 }
 0x270   :  { %v4627_v35 = vpop.f32.mrf.mxu1 }
 0x271   :  { %v4628_v63 = vadd.f32 %v4627_v35, %v4626_v42  ;;  %1530 = vadd.xlane.f32.xlu1 %v1475_v37  ;;  %v1437_v58 = vadd.f32 %v1405_v3, %v1351_v7 }
 0x272   :  { %v4629_v55 = vpop.f32.mrf.mxu1 }
 0x273   :  { %v1354_v44 = vadd.f32 %v4628_v63, %v5842_v54  ;;  %v1476_v46 = vmul.f32 %v5848_v34, %v1437_v58 }
 0x274   :  { %v4630_v48 = vpop.f32.mrf.mxu1 }
 0x275   :  { %v4631_v30 = vadd.f32 %v4630_v48, %v4629_v55  ;;  %1532 = vadd.xlane.f32.xlu0 %v1476_v46  ;;  %v1438_v29 = vadd.f32 %v1406_v17, %v1354_v44 }
 0x276   :  { %v4632_v27 = vpop.f32.mrf.mxu1 }
 0x277   :  { %v1359_v8 = vadd.f32 %v4631_v30, %v5842_v54  ;;  %v1477_v56 = vmul.f32 %v5848_v34, %v1438_v29 }
 0x278   :  { %v4633_v36 = vpop.f32.mrf.mxu1 }
 0x279   :  { %v4634_v62 = vadd.f32 %v4633_v36, %v4632_v27  ;;  %1534 = vadd.xlane.f32.xlu1 %v1477_v56  ;;  %v1439_v0 = vadd.f32 %v1407_v10, %v1359_v8 }
 0x27a   :  { %v4635_v57 = vpop.f32.mrf.mxu1 }
 0x27b   :  { %v1362_v25 = vadd.f32 %v4634_v62, %v5842_v54  ;;  %v1478_v9 = vmul.f32 %v5848_v34, %v1439_v0 }
 0x27c   :  { %v4636_v43 = vpop.f32.mrf.mxu1 }
 0x27d   :  { %v4637_v28 = vadd.f32 %v4636_v43, %v4635_v57  ;;  %1536 = vadd.xlane.f32.xlu0 %v1478_v9  ;;  %v1440_v31 = vadd.f32 %v1408_v32, %v1362_v25 }
 0x27e   :  { %v4638_v12 = vpop.f32.mrf.mxu1 }
 0x27f   :  { %v1367_v60 = vadd.f32 %v4637_v28, %v5842_v54  ;;  %v1479_v41 = vmul.f32 %v5848_v34, %v1440_v31 }
 0x280   :  { %v4639_v13 = vpop.f32.mrf.mxu1 }
 0x281   :  { %v4640_v15 = vadd.f32 %v4639_v13, %v4638_v12  ;;  %1538 = vadd.xlane.f32.xlu1 %v1479_v41  ;;  %v1441_v40 = vadd.f32 %v1409_v45, %v1367_v60 }
 0x282   :  { %v4641_v52 = vpop.f32.mrf.mxu1 }
 0x283   :  { %v1370_v14 = vadd.f32 %v4640_v15, %v5842_v54  ;;  %v1480_v6 = vmul.f32 %v5848_v34, %v1441_v40 }
 0x284   :  { %v1485_v24 = vpop.xlane.xlu0 %1484  ;;  %v4642_v39 = vpop.f32.mrf.mxu1 }
 0x285   :  { %v1583_v11 = vrot.slane %v1485_v24, %v5124_v51  ;;  %v1587_v5 = vrot.slane %v1485_v24, %v5130_v53  ;;  %v1591_v22 = vrot.slane %v1485_v24, %v5949_v61  ;;  %v1595_v3 = vrot.slane %v1485_v24, %v5952_v38  ;;  %1540 = vadd.xlane.f32.xlu0 %v1480_v6 }
 0x286   :  { %v4643_v42 = vadd.f32 %v4642_v39, %v4641_v52  ;;  %v1442_v7 = vadd.f32 %v1410_v21, %v1370_v14  ;;  %v1599_v37 = vrot.slane %v1485_v24, %v5955_v20  ;;  %v1603_v35 = vrot.slane %v1485_v24, %v5958_v59  ;;  %v4644_v63 = vpop.f32.mrf.mxu1 }
 0x287   :  { %v1607_v58 = vrot.slane %v1485_v24, %v5961_v19  ;;  %v1611_v17 = vrot.slane %v1485_v24, %v5964_v16  ;;  %v2604_v55 = vcombine.low %v1583_v11, %v1587_v5  ;;  %v2605_v44 = vcombine.low %v1591_v22, %v1595_v3 }
 0x288   :  { %v1375_v46 = vadd.f32 %v4643_v42, %v5842_v54  ;;  %v1481_v48 = vmul.f32 %v5848_v34, %v1442_v7  ;;  %v1487_v30 = vpop.xlane.xlu0 %1486  ;;  %v4645_v29 = vpop.f32.mrf.mxu1  ;;  %v2606_v10 = vcombine.low %v1599_v37, %v1603_v35 }
 0x289   :  { %v2607_v27 = vcombine.low %v1607_v58, %v1611_v17  ;;  %v4646_v8 = vadd.f32 %v4645_v29, %v4644_v63  ;;  %v1615_v36 = vrot.slane %v1487_v30, %v5124_v51  ;;  %v1619_v62 = vrot.slane %v1487_v30, %v5130_v53 }
 0x28a   :  { %1542 = vadd.xlane.f32.xlu1 %v1481_v48  ;;  %v1443_v56 = vadd.f32 %v1411_v2, %v1375_v46  ;;  %v2614_v0 = vrot.slane %v2604_v55, %v5972_v33  ;;  %v2621_v32 = vrot.slane %v2605_v44, %v5972_v33  ;;  %v1623_v57 = vrot.slane %v1487_v30, %v5949_v61 }
 0x28b   :  { %v1627_v25 = vrot.slane %v1487_v30, %v5952_v38  ;;  %v1378_v9 = vadd.f32 %v4646_v8, %v5842_v54  ;;  %v1631_v23 = vrot.slane %v1487_v30, %v5955_v20  ;;  %v1635_v43 = vrot.slane %v1487_v30, %v5958_v59 }
 0x28c   :  { %v1482_v26 = vmul.f32 %v5848_v34, %v1443_v56  ;;  %v2628_v28 = vrot.slane %v2606_v10, %v5972_v33  ;;  %v2635_v31 = vrot.slane %v2607_v27, %v5972_v33  ;;  %v1639_v4 = vrot.slane %v1487_v30, %v5961_v19 }
 0x28d   :  { %v1643_v45 = vrot.slane %v1487_v30, %v5964_v16  ;;  %v1444_v12 = vadd.f32 %v1412_v47, %v1378_v9  ;;  %v2653_v60 = vcombine.low %v1615_v36, %v1619_v62  ;;  %v2654_v41 = vcombine.low %v1623_v57, %v1627_v25 }
 0x28e   :  { %1544 = vadd.xlane.f32.xlu0 %v1482_v26  ;;  %v2655_v1 = vcombine.low %v1631_v23, %v1635_v43  ;;  %v2636_v54 = vcombine.low %v2614_v0, %v2621_v32  ;;  %v2637_v6 = vcombine.low %v2628_v28, %v2635_v31 }
 0x28f   :  { %v2656_v13 = vcombine.low %v1639_v4, %v1643_v45  ;;  %v1483_v21 = vmul.f32 %v5848_v34, %v1444_v12  ;;  %v2663_v15 = vrot.slane %v2653_v60, %v5972_v33  ;;  %v2670_v40 = vrot.slane %v2654_v41, %v5972_v33 }
 0x290   :  { %v2677_v52 = vrot.slane %v2655_v1, %v5972_v33  ;;  %v2644_v42 = vrot.slane %v2636_v54, %v5972_v33  ;;  %v2651_v58 = vrot.slane %v2637_v6, %v5972_v33 }
 0x291   :  { %v1489_v14 = vpop.xlane.xlu1 %1488  ;;  %v2684_v18 = vrot.slane %v2656_v13, %v5972_v33  ;;  %1546 = vadd.xlane.f32.xlu1 %v1483_v21  ;;  %v2685_v2 = vcombine.low %v2663_v15, %v2670_v40 }
 0x292   :  { %v1647_v24 = vrot.slane %v1489_v14, %v5124_v51  ;;  %v1651_v39 = vrot.slane %v1489_v14, %v5130_v53  ;;  %v1655_v11 = vrot.slane %v1489_v14, %v5949_v61  ;;  %v1659_v34 = vrot.slane %v1489_v14, %v5952_v38 }
 0x293   :  { %v2686_v5 = vcombine.low %v2677_v52, %v2684_v18  ;;  %v1663_v22 = vrot.slane %v1489_v14, %v5955_v20  ;;  %v1667_v3 = vrot.slane %v1489_v14, %v5958_v59  ;;  %v1671_v7 = vrot.slane %v1489_v14, %v5961_v19 }
 0x294   :  { %v1675_v37 = vrot.slane %v1489_v14, %v5964_v16  ;;  %v2702_v35 = vcombine.low %v1647_v24, %v1651_v39  ;;  %v2693_v17 = vrot.slane %v2685_v2, %v5972_v33  ;;  %v2703_v55 = vcombine.low %v1655_v11, %v1659_v34 }
 0x295   :  { %v1491_v63 = vpop.xlane.xlu1 %1490  ;;  %v2704_v44 = vcombine.low %v1663_v22, %v1667_v3  ;;  %v2700_v47 = vrot.slane %v2686_v5, %v5972_v33  ;;  %v2652_v28 = vcombine.low %v2644_v42, %v2651_v58 }
 0x296   :  { %v2705_v46 = vcombine.low %v1671_v7, %v1675_v37  ;;  %v2712_v48 = vrot.slane %v2702_v35, %v5972_v33  ;;  %v1679_v30 = vrot.slane %v1491_v63, %v5124_v51  ;;  %v1683_v29 = vrot.slane %v1491_v63, %v5130_v53 }
 0x297   :  { %v2719_v10 = vrot.slane %v2703_v55, %v5972_v33  ;;  %v2726_v27 = vrot.slane %v2704_v44, %v5972_v33  ;;  %v1687_v8 = vrot.slane %v1491_v63, %v5949_v61  ;;  %v1691_v36 = vrot.slane %v1491_v63, %v5952_v38 }
 0x298   :  { %v2733_v56 = vrot.slane %v2705_v46, %v5972_v33  ;;  %v1695_v62 = vrot.slane %v1491_v63, %v5955_v20  ;;  %v1699_v0 = vrot.slane %v1491_v63, %v5958_v59  ;;  %v1703_v57 = vrot.slane %v1491_v63, %v5961_v19 }
 0x299   :  { %v2734_v32 = vcombine.low %v2712_v48, %v2719_v10  ;;  %v1707_v25 = vrot.slane %v1491_v63, %v5964_v16  ;;  %v2751_v9 = vcombine.low %v1679_v30, %v1683_v29  ;;  %v2752_v23 = vcombine.low %v1687_v8, %v1691_v36 }
 0x29a   :  { %v2735_v26 = vcombine.low %v2726_v27, %v2733_v56  ;;  %v2753_v43 = vcombine.low %v1695_v62, %v1699_v0  ;;  %v2701_v4 = vcombine.low %v2693_v17, %v2700_v47 }
 0x29b   :  { %v1493_v31 = vpop.xlane.xlu0 %1492  ;;  %v2754_v45 = vcombine.low %v1703_v57, %v1707_v25  ;;  %v2761_v12 = vrot.slane %v2751_v9, %v5972_v33  ;;  %v2742_v60 = vrot.slane %v2734_v32, %v5972_v33  ;;  %v2768_v41 = vrot.slane %v2752_v23, %v5972_v33 }
 0x29c   :  { %v2775_v1 = vrot.slane %v2753_v43, %v5972_v33  ;;  %v1711_v54 = vrot.slane %v1493_v31, %v5124_v51  ;;  %v1715_v21 = vrot.slane %v1493_v31, %v5130_v53  ;;  %v1719_v15 = vrot.slane %v1493_v31, %v5949_v61 }
 0x29d   :  { %v2782_v13 = vrot.slane %v2754_v45, %v5972_v33  ;;  %v1723_v40 = vrot.slane %v1493_v31, %v5952_v38  ;;  %v2749_v52 = vrot.slane %v2735_v26, %v5972_v33  ;;  %v2783_v14 = vcombine.low %v2761_v12, %v2768_v41 }
 0x29e   :  { %v1727_v6 = vrot.slane %v1493_v31, %v5955_v20  ;;  %v1731_v18 = vrot.slane %v1493_v31, %v5958_v59  ;;  %v1735_v39 = vrot.slane %v1493_v31, %v5961_v19  ;;  %v1739_v11 = vrot.slane %v1493_v31, %v5964_v16 }
 0x29f   :  { %v1495_v2 = vpop.xlane.xlu1 %1494  ;;  %v2784_v24 = vcombine.low %v2775_v1, %v2782_v13  ;;  %v2800_v5 = vcombine.low %v1711_v54, %v1715_v21  ;;  %v2791_v34 = vrot.slane %v2783_v14, %v5972_v33  ;;  %v2801_v22 = vcombine.low %v1719_v15, %v1723_v40 }
 0x2a0   :  { %v2802_v3 = vcombine.low %v1727_v6, %v1731_v18  ;;  %v1743_v42 = vrot.slane %v1495_v2, %v5124_v51  ;;  %v2803_v37 = vcombine.low %v1735_v39, %v1739_v11  ;;  %v1747_v63 = vrot.slane %v1495_v2, %v5130_v53 }
 0x2a1   :  { %v2798_v7 = vrot.slane %v2784_v24, %v5972_v33  ;;  %v2810_v35 = vrot.slane %v2800_v5, %v5972_v33  ;;  %v2817_v58 = vrot.slane %v2801_v22, %v5972_v33  ;;  %v1751_v55 = vrot.slane %v1495_v2, %v5949_v61 }
 0x2a2   :  { %v2824_v17 = vrot.slane %v2802_v3, %v5972_v33  ;;  %v1755_v44 = vrot.slane %v1495_v2, %v5952_v38  ;;  %4176 = vperm.xlu1 %4652, %v2701_v4   ;;  %v2750_v46 = vcombine.low %v2742_v60, %v2749_v52  ;;  %v2831_v48 = vrot.slane %v2803_v37, %v5972_v33 }
 0x2a3   :  { %v1759_v30 = vrot.slane %v1495_v2, %v5955_v20  ;;  %v1763_v29 = vrot.slane %v1495_v2, %v5958_v59  ;;  %v2832_v47 = vcombine.low %v2810_v35, %v2817_v58  ;;  %v1767_v10 = vrot.slane %v1495_v2, %v5961_v19 }
 0x2a4   :  { %4173 = vperm.xlu0 %4651, %v2652_v28   ;;  %v1771_v27 = vrot.slane %v1495_v2, %v5964_v16  ;;  %v2849_v8 = vcombine.low %v1743_v42, %v1747_v63  ;;  %v2799_v36 = vcombine.low %v2791_v34, %v2798_v7  ;;  %v2833_v62 = vcombine.low %v2824_v17, %v2831_v48 }
 0x2a5   :  { %v1497_v56 = vpop.xlane.xlu0 %1496  ;;  %v2850_v0 = vcombine.low %v1751_v55, %v1755_v44  ;;  %v2851_v32 = vcombine.low %v1759_v30, %v1763_v29  ;;  %v2840_v57 = vrot.slane %v2832_v47, %v5972_v33 }
 0x2a6   :  { %v2852_v25 = vcombine.low %v1767_v10, %v1771_v27  ;;  %v2859_v9 = vrot.slane %v2849_v8, %v5972_v33  ;;  %v1775_v26 = vrot.slane %v1497_v56, %v5124_v51  ;;  %4179 = vperm.xlu1 %4652, %v2750_v46   ;;  %v2847_v23 = vrot.slane %v2833_v62, %v5972_v33 }
 0x2a7   :  { %v2866_v43 = vrot.slane %v2850_v0, %v5972_v33  ;;  %v2873_v28 = vrot.slane %v2851_v32, %v5972_v33  ;;  %v1779_v31 = vrot.slane %v1497_v56, %v5130_v53  ;;  %v1783_v45 = vrot.slane %v1497_v56, %v5949_v61 }
 0x2a8   :  { %v2880_v4 = vrot.slane %v2852_v25, %v5972_v33  ;;  %v1787_v12 = vrot.slane %v1497_v56, %v5952_v38  ;;  %v1791_v60 = vrot.slane %v1497_v56, %v5955_v20  ;;  %v2848_v1 = vcombine.low %v2840_v57, %v2847_v23 }
 0x2a9   :  { %v1499_v41 = vpop.xlane.xlu1 %1498  ;;  %v2881_v54 = vcombine.low %v2859_v9, %v2866_v43  ;;  %v1795_v13 = vrot.slane %v1497_v56, %v5958_v59  ;;  %v1799_v21 = vrot.slane %v1497_v56, %v5961_v19  ;;  %v1803_v40 = vrot.slane %v1497_v56, %v5964_v16 }
 0x2aa   :  { %v2882_v15 = vcombine.low %v2873_v28, %v2880_v4  ;;  %v2898_v52 = vcombine.low %v1775_v26, %v1779_v31  ;;  %v2899_v14 = vcombine.low %v1783_v45, %v1787_v12  ;;  %4182 = vperm.xlu1 %4652, %v2799_v36   ;;  %v1807_v2 = vrot.slane %v1499_v41, %v5124_v51 }
 0x2ab   :  { %v2889_v6 = vrot.slane %v2881_v54, %v5972_v33  ;;  %v2900_v18 = vcombine.low %v1791_v60, %v1795_v13  ;;  %v1811_v24 = vrot.slane %v1499_v41, %v5130_v53  ;;  %v2901_v11 = vcombine.low %v1799_v21, %v1803_v40 }
 0x2ac   :  { %v2896_v39 = vrot.slane %v2882_v15, %v5972_v33  ;;  %v2908_v5 = vrot.slane %v2898_v52, %v5972_v33  ;;  %v2915_v34 = vrot.slane %v2899_v14, %v5972_v33  ;;  %v1815_v3 = vrot.slane %v1499_v41, %v5949_v61 }
 0x2ad   :  { %v2922_v22 = vrot.slane %v2900_v18, %v5972_v33  ;;  %v1819_v42 = vrot.slane %v1499_v41, %v5952_v38  ;;  %v1823_v7 = vrot.slane %v1499_v41, %v5955_v20  ;;  %v2929_v35 = vrot.slane %v2901_v11, %v5972_v33 }
 0x2ae   :  { %v2897_v37 = vcombine.low %v2889_v6, %v2896_v39  ;;  %v2930_v63 = vcombine.low %v2908_v5, %v2915_v34  ;;  %v1827_v58 = vrot.slane %v1499_v41, %v5958_v59  ;;  %4185 = vperm.xlu1 %4652, %v2848_v1   ;;  %v1831_v17 = vrot.slane %v1499_v41, %v5961_v19 }
 0x2af   :  { %v1835_v55 = vrot.slane %v1499_v41, %v5964_v16  ;;  %v2947_v44 = vcombine.low %v1807_v2, %v1811_v24  ;;  %v2948_v46 = vcombine.low %v1815_v3, %v1819_v42  ;;  %v2931_v48 = vcombine.low %v2922_v22, %v2929_v35 }
 0x2b0   :  { %v2938_v30 = vrot.slane %v2930_v63, %v5972_v33  ;;  %v2949_v29 = vcombine.low %v1823_v7, %v1827_v58 }
 0x2b1   :  { %v1501_v47 = vpop.xlane.xlu0 %1500  ;;  %v2950_v10 = vcombine.low %v1831_v17, %v1835_v55  ;;  %v2957_v27 = vrot.slane %v2947_v44, %v5972_v33  ;;  %v2964_v8 = vrot.slane %v2948_v46, %v5972_v33  ;;  %v2945_v56 = vrot.slane %v2931_v48, %v5972_v33 }
 0x2b2   :  { %v2971_v36 = vrot.slane %v2949_v29, %v5972_v33  ;;  %v1839_v62 = vrot.slane %v1501_v47, %v5124_v51  ;;  %v1843_v0 = vrot.slane %v1501_v47, %v5130_v53  ;;  %4188 = vperm.xlu1 %4652, %v2897_v37   ;;  %v1847_v25 = vrot.slane %v1501_v47, %v5949_v61 }
 0x2b3   :  { %v2978_v32 = vrot.slane %v2950_v10, %v5972_v33  ;;  %v2979_v57 = vcombine.low %v2957_v27, %v2964_v8  ;;  %v1851_v9 = vrot.slane %v1501_v47, %v5952_v38  ;;  %v2946_v26 = vcombine.low %v2938_v30, %v2945_v56 }
 0x2b4   :  { %v1855_v23 = vrot.slane %v1501_v47, %v5955_v20  ;;  %v1859_v43 = vrot.slane %v1501_v47, %v5958_v59  ;;  %v1863_v28 = vrot.slane %v1501_v47, %v5961_v19  ;;  %v1867_v12 = vrot.slane %v1501_v47, %v5964_v16 }
 0x2b5   :  { %v1503_v31 = vpop.xlane.xlu1 %1502  ;;  %v2980_v4 = vcombine.low %v2971_v36, %v2978_v32  ;;  %v2987_v45 = vrot.slane %v2979_v57, %v5972_v33  ;;  %v2996_v60 = vcombine.low %v1839_v62, %v1843_v0  ;;  %v2997_v41 = vcombine.low %v1847_v25, %v1851_v9 }
 0x2b6   :  { %v2998_v1 = vcombine.low %v1855_v23, %v1859_v43  ;;  %v1871_v54 = vrot.slane %v1503_v31, %v5124_v51  ;;  %v1875_v13 = vrot.slane %v1503_v31, %v5130_v53  ;;  %4191 = vperm.xlu1 %4652, %v2946_v26   ;;  %v2999_v15 = vcombine.low %v1863_v28, %v1867_v12 }
 0x2b7   :  { %v2994_v21 = vrot.slane %v2980_v4, %v5972_v33  ;;  %v3006_v40 = vrot.slane %v2996_v60, %v5972_v33  ;;  %v1879_v52 = vrot.slane %v1503_v31, %v5949_v61  ;;  %v3013_v14 = vrot.slane %v2997_v41, %v5972_v33 }
 0x2b8   :  { %v3020_v6 = vrot.slane %v2998_v1, %v5972_v33  ;;  %v1883_v18 = vrot.slane %v1503_v31, %v5952_v38  ;;  %v1887_v2 = vrot.slane %v1503_v31, %v5955_v20  ;;  %v3027_v39 = vrot.slane %v2999_v15, %v5972_v33 }
 0x2b9   :  { %v2995_v24 = vcombine.low %v2987_v45, %v2994_v21  ;;  %v1891_v11 = vrot.slane %v1503_v31, %v5958_v59  ;;  %v1895_v5 = vrot.slane %v1503_v31, %v5961_v19  ;;  %v3028_v34 = vcombine.low %v3006_v40, %v3013_v14 }
 0x2ba   :  { %v1899_v22 = vrot.slane %v1503_v31, %v5964_v16  ;;  %v3045_v3 = vcombine.low %v1871_v54, %v1875_v13  ;;  %v3046_v42 = vcombine.low %v1879_v52, %v1883_v18  ;;  %v3029_v37 = vcombine.low %v3020_v6, %v3027_v39 }
 0x2bb   :  { %v1505_v7 = vpop.xlane.xlu0 %1504  ;;  %4194 = vperm.xlu1 %4652, %v2995_v24   ;;  %v3047_v35 = vcombine.low %v1887_v2, %v1891_v11  ;;  %v3036_v63 = vrot.slane %v3028_v34, %v5972_v33 }
 0x2bc   :  { %v3048_v58 = vcombine.low %v1895_v5, %v1899_v22  ;;  %v3055_v17 = vrot.slane %v3045_v3, %v5972_v33  ;;  %v3062_v55 = vrot.slane %v3046_v42, %v5972_v33  ;;  %v3043_v44 = vrot.slane %v3029_v37, %v5972_v33 }
 0x2bd   :  { %v3069_v46 = vrot.slane %v3047_v35, %v5972_v33  ;;  %v1903_v48 = vrot.slane %v1505_v7, %v5124_v51  ;;  %v1907_v30 = vrot.slane %v1505_v7, %v5130_v53  ;;  %v1911_v10 = vrot.slane %v1505_v7, %v5949_v61 }
 0x2be   :  { %v3076_v29 = vrot.slane %v3048_v58, %v5972_v33  ;;  %v3077_v47 = vcombine.low %v3055_v17, %v3062_v55  ;;  %v1915_v27 = vrot.slane %v1505_v7, %v5952_v38  ;;  %v3044_v56 = vcombine.low %v3036_v63, %v3043_v44 }
 0x2bf   :  { %v1507_v8 = vpop.xlane.xlu1 %1506  ;;  %v1919_v36 = vrot.slane %v1505_v7, %v5955_v20  ;;  %v1923_v62 = vrot.slane %v1505_v7, %v5958_v59  ;;  %v1927_v0 = vrot.slane %v1505_v7, %v5961_v19  ;;  %v1931_v25 = vrot.slane %v1505_v7, %v5964_v16 }
 0x2c0   :  { %v3078_v32 = vcombine.low %v3069_v46, %v3076_v29  ;;  %v3085_v57 = vrot.slane %v3077_v47, %v5972_v33  ;;  %v3094_v9 = vcombine.low %v1903_v48, %v1907_v30  ;;  %4197 = vperm.xlu1 %4652, %v3044_v56   ;;  %v3095_v26 = vcombine.low %v1911_v10, %v1915_v27 }
 0x2c1   :  { %v3096_v23 = vcombine.low %v1919_v36, %v1923_v62  ;;  %v1935_v43 = vrot.slane %v1507_v8, %v5124_v51  ;;  %v1939_v28 = vrot.slane %v1507_v8, %v5130_v53  ;;  %v3097_v4 = vcombine.low %v1927_v0, %v1931_v25 }
 0x2c2   :  { %v3092_v31 = vrot.slane %v3078_v32, %v5972_v33  ;;  %v3104_v45 = vrot.slane %v3094_v9, %v5972_v33  ;;  %v1943_v12 = vrot.slane %v1507_v8, %v5949_v61  ;;  %v3111_v60 = vrot.slane %v3095_v26, %v5972_v33 }
 0x2c3   :  { %v3118_v41 = vrot.slane %v3096_v23, %v5972_v33  ;;  %v1947_v1 = vrot.slane %v1507_v8, %v5952_v38  ;;  %v1951_v54 = vrot.slane %v1507_v8, %v5955_v20  ;;  %v3125_v21 = vrot.slane %v3097_v4, %v5972_v33 }
 0x2c4   :  { %v3093_v13 = vcombine.low %v3085_v57, %v3092_v31  ;;  %v1955_v15 = vrot.slane %v1507_v8, %v5958_v59  ;;  %v1959_v40 = vrot.slane %v1507_v8, %v5961_v19  ;;  %v3126_v14 = vcombine.low %v3104_v45, %v3111_v60 }
 0x2c5   :  { %v1509_v52 = vpop.xlane.xlu0 %1508  ;;  %v1963_v6 = vrot.slane %v1507_v8, %v5964_v16  ;;  %v3143_v18 = vcombine.low %v1935_v43, %v1939_v28  ;;  %v3144_v2 = vcombine.low %v1943_v12, %v1947_v1  ;;  %v3127_v24 = vcombine.low %v3118_v41, %v3125_v21 }
 0x2c6   :  { %4200 = vperm.xlu0 %4651, %v3093_v13   ;;  %v3145_v39 = vcombine.low %v1951_v54, %v1955_v15  ;;  %v1967_v11 = vrot.slane %v1509_v52, %v5124_v51  ;;  %v1971_v5 = vrot.slane %v1509_v52, %v5130_v53  ;;  %v3134_v34 = vrot.slane %v3126_v14, %v5972_v33 }
 0x2c7   :  { %v3146_v22 = vcombine.low %v1959_v40, %v1963_v6  ;;  %v3153_v3 = vrot.slane %v3143_v18, %v5972_v33  ;;  %v3160_v42 = vrot.slane %v3144_v2, %v5972_v33  ;;  %v3141_v7 = vrot.slane %v3127_v24, %v5972_v33 }
 0x2c8   :  { %v3167_v37 = vrot.slane %v3145_v39, %v5972_v33  ;;  %v1975_v35 = vrot.slane %v1509_v52, %v5949_v61  ;;  %v1979_v63 = vrot.slane %v1509_v52, %v5952_v38  ;;  %v1983_v44 = vrot.slane %v1509_v52, %v5955_v20 }
 0x2c9   :  { %v1511_v58 = vpop.xlane.xlu1 %1510  ;;  %v3174_v17 = vrot.slane %v3146_v22, %v5972_v33  ;;  %v3175_v55 = vcombine.low %v3153_v3, %v3160_v42  ;;  %v1987_v46 = vrot.slane %v1509_v52, %v5958_v59  ;;  %v3142_v48 = vcombine.low %v3134_v34, %v3141_v7 }
 0x2ca   :  { %v1991_v30 = vrot.slane %v1509_v52, %v5961_v19  ;;  %v1995_v29 = vrot.slane %v1509_v52, %v5964_v16  ;;  %v3192_v47 = vcombine.low %v1967_v11, %v1971_v5  ;;  %v3193_v8 = vcombine.low %v1975_v35, %v1979_v63 }
 0x2cb   :  { %v3176_v10 = vcombine.low %v3167_v37, %v3174_v17  ;;  %v3183_v27 = vrot.slane %v3175_v55, %v5972_v33  ;;  %v3194_v56 = vcombine.low %v1983_v44, %v1987_v46  ;;  %4203 = vperm.xlu1 %4652, %v3142_v48   ;;  %v1999_v0 = vrot.slane %v1511_v58, %v5124_v51 }
 0x2cc   :  { %v3195_v36 = vcombine.low %v1991_v30, %v1995_v29  ;;  %v3202_v62 = vrot.slane %v3192_v47, %v5972_v33  ;;  %v2003_v32 = vrot.slane %v1511_v58, %v5130_v53  ;;  %v3209_v25 = vrot.slane %v3193_v8, %v5972_v33 }
 0x2cd   :  { %v3190_v57 = vrot.slane %v3176_v10, %v5972_v33  ;;  %v3216_v9 = vrot.slane %v3194_v56, %v5972_v33  ;;  %v2007_v26 = vrot.slane %v1511_v58, %v5949_v61  ;;  %v2011_v43 = vrot.slane %v1511_v58, %v5952_v38 }
 0x2ce   :  { %v3223_v23 = vrot.slane %v3195_v36, %v5972_v33  ;;  %v2015_v28 = vrot.slane %v1511_v58, %v5955_v20  ;;  %v2019_v31 = vrot.slane %v1511_v58, %v5958_v59  ;;  %v3224_v12 = vcombine.low %v3202_v62, %v3209_v25 }
 0x2cf   :  { %v1513_v4 = vpop.xlane.xlu0 %1512  ;;  %v3191_v45 = vcombine.low %v3183_v27, %v3190_v57  ;;  %v2023_v60 = vrot.slane %v1511_v58, %v5961_v19  ;;  %v2027_v41 = vrot.slane %v1511_v58, %v5964_v16  ;;  %v3241_v54 = vcombine.low %v1999_v0, %v2003_v32 }
 0x2d0   :  { %v3225_v1 = vcombine.low %v3216_v9, %v3223_v23  ;;  %v3242_v13 = vcombine.low %v2007_v26, %v2011_v43  ;;  %v3243_v21 = vcombine.low %v2015_v28, %v2019_v31  ;;  %v3232_v15 = vrot.slane %v3224_v12, %v5972_v33 }
 0x2d1   :  { %4206 = vperm.xlu1 %4652, %v3191_v45   ;;  %v3244_v40 = vcombine.low %v2023_v60, %v2027_v41  ;;  %v2031_v52 = vrot.slane %v1513_v4, %v5124_v51  ;;  %v2035_v14 = vrot.slane %v1513_v4, %v5130_v53  ;;  %v3251_v18 = vrot.slane %v3241_v54, %v5972_v33 }
 0x2d2   :  { %v3239_v6 = vrot.slane %v3225_v1, %v5972_v33  ;;  %v3258_v2 = vrot.slane %v3242_v13, %v5972_v33  ;;  %v3265_v24 = vrot.slane %v3243_v21, %v5972_v33  ;;  %v2039_v5 = vrot.slane %v1513_v4, %v5949_v61 }
 0x2d3   :  { %v1515_v39 = vpop.xlane.xlu1 %1514  ;;  %v3272_v11 = vrot.slane %v3244_v40, %v5972_v33  ;;  %v2043_v34 = vrot.slane %v1513_v4, %v5952_v38  ;;  %v2047_v22 = vrot.slane %v1513_v4, %v5955_v20  ;;  %v2051_v7 = vrot.slane %v1513_v4, %v5958_v59 }
 0x2d4   :  { %v3240_v3 = vcombine.low %v3232_v15, %v3239_v6  ;;  %v3273_v42 = vcombine.low %v3251_v18, %v3258_v2  ;;  %v2055_v37 = vrot.slane %v1513_v4, %v5961_v19  ;;  %v2059_v63 = vrot.slane %v1513_v4, %v5964_v16 }
 0x2d5   :  { %v3274_v35 = vcombine.low %v3265_v24, %v3272_v11  ;;  %v3290_v58 = vcombine.low %v2031_v52, %v2035_v14  ;;  %v3291_v17 = vcombine.low %v2039_v5, %v2043_v34  ;;  %v3292_v44 = vcombine.low %v2047_v22, %v2051_v7 }
 0x2d6   :  { %4209 = vperm.xlu1 %4652, %v3240_v3   ;;  %v3281_v55 = vrot.slane %v3273_v42, %v5972_v33  ;;  %v2063_v46 = vrot.slane %v1515_v39, %v5124_v51  ;;  %v2067_v48 = vrot.slane %v1515_v39, %v5130_v53  ;;  %v3293_v29 = vcombine.low %v2055_v37, %v2059_v63 }
 0x2d7   :  { %v3288_v30 = vrot.slane %v3274_v35, %v5972_v33  ;;  %v3300_v47 = vrot.slane %v3290_v58, %v5972_v33  ;;  %v3307_v10 = vrot.slane %v3291_v17, %v5972_v33  ;;  %v3314_v27 = vrot.slane %v3292_v44, %v5972_v33 }
 0x2d8   :  { %v2071_v8 = vrot.slane %v1515_v39, %v5949_v61  ;;  %v2075_v56 = vrot.slane %v1515_v39, %v5952_v38  ;;  %v2079_v36 = vrot.slane %v1515_v39, %v5955_v20  ;;  %v3321_v0 = vrot.slane %v3293_v29, %v5972_v33 }
 0x2d9   :  { %v3289_v62 = vcombine.low %v3281_v55, %v3288_v30  ;;  %v6192_v32 = vcombine.low %v3300_v47, %v3307_v10  ;;  %v2083_v57 = vrot.slane %v1515_v39, %v5958_v59  ;;  %v1517_v25 = vpop.xlane.xlu0 %1516  ;;  %v2087_v9 = vrot.slane %v1515_v39, %v5961_v19 }
 0x2da   :  { %v2091_v26 = vrot.slane %v1515_v39, %v5964_v16  ;;  %v6197_v23 = vcombine.low %v2063_v46, %v2067_v48  ;;  %v6199_v43 = vcombine.low %v2071_v8, %v2075_v56  ;;  %v2095_v28 = vrot.slane %v1517_v25, %v5124_v51 }
 0x2db   :  { %4212 = vperm.xlu1 %4652, %v3289_v62   ;;  %v2099_v31 = vrot.slane %v1517_v25, %v5130_v53  ;;  %v2103_v4 = vrot.slane %v1517_v25, %v5949_v61  ;;  %v2107_v45 = vrot.slane %v1517_v25, %v5952_v38  ;;  %v2111_v12 = vrot.slane %v1517_v25, %v5955_v20 }
 0x2dc   :  { %v2115_v60 = vrot.slane %v1517_v25, %v5958_v59  ;;  %v2119_v41 = vrot.slane %v1517_v25, %v5961_v19  ;;  %v2123_v1 = vrot.slane %v1517_v25, %v5964_v16  ;;  %v6209_v21 = vcombine.low %v3314_v27, %v3321_v0 }
 0x2dd   :  { %v3388_v54 = vcombine.low %v2095_v28, %v2099_v31  ;;  %v3389_v13 = vcombine.low %v2103_v4, %v2107_v45  ;;  %v3330_v15 = vrot.slane %v6192_v32, %v5972_v33  ;;  %v1519_v40 = vpop.xlane.xlu1 %1518  ;;  %v6213_v6 = vcombine.low %v2079_v36, %v2083_v57 }
 0x2de   :  { %v3390_v52 = vcombine.low %v2111_v12, %v2115_v60  ;;  %v3391_v14 = vcombine.low %v2119_v41, %v2123_v1  ;;  %v6215_v18 = vcombine.low %v2087_v9, %v2091_v26  ;;  %v2127_v39 = vrot.slane %v1519_v40, %v5124_v51 }
 0x2df   :  { %v3398_v2 = vrot.slane %v3388_v54, %v5972_v33  ;;  %v3405_v24 = vrot.slane %v3389_v13, %v5972_v33  ;;  %v2131_v11 = vrot.slane %v1519_v40, %v5130_v53  ;;  %v2135_v22 = vrot.slane %v1519_v40, %v5949_v61 }
 0x2e0   :  { %v3412_v5 = vrot.slane %v3390_v52, %v5972_v33  ;;  %v3419_v34 = vrot.slane %v3391_v14, %v5972_v33  ;;  %v2139_v3 = vrot.slane %v1519_v40, %v5952_v38  ;;  %v2143_v7 = vrot.slane %v1519_v40, %v5955_v20 }
 0x2e1   :  { %v3420_v42 = vcombine.low %v3398_v2, %v3405_v24  ;;  %v2147_v37 = vrot.slane %v1519_v40, %v5958_v59  ;;  %v2151_v35 = vrot.slane %v1519_v40, %v5961_v19  ;;  %v2155_v58 = vrot.slane %v1519_v40, %v5964_v16 }
 0x2e2   :  { %v3421_v63 = vcombine.low %v3412_v5, %v3419_v34  ;;  %v3437_v17 = vcombine.low %v2127_v39, %v2131_v11  ;;  %v3438_v55 = vcombine.low %v2135_v22, %v2139_v3  ;;  %v3337_v48 = vrot.slane %v6209_v21, %v5972_v33 }
 0x2e3   :  { %v3428_v44 = vrot.slane %v3420_v42, %v5972_v33  ;;  %v3439_v46 = vcombine.low %v2143_v7, %v2147_v37  ;;  %v3349_v30 = vrot.slane %v6197_v23, %v5972_v33  ;;  %v1521_v29 = vpop.xlane.xlu0 %1520  ;;  %v3440_v10 = vcombine.low %v2151_v35, %v2155_v58 }
 0x2e4   :  { %v3435_v47 = vrot.slane %v3421_v63, %v5972_v33  ;;  %v3447_v27 = vrot.slane %v3437_v17, %v5972_v33  ;;  %v3454_v8 = vrot.slane %v3438_v55, %v5972_v33  ;;  %v2159_v36 = vrot.slane %v1521_v29, %v5124_v51 }
 0x2e5   :  { %v3461_v56 = vrot.slane %v3439_v46, %v5972_v33  ;;  %v2163_v62 = vrot.slane %v1521_v29, %v5130_v53  ;;  %v2167_v0 = vrot.slane %v1521_v29, %v5949_v61  ;;  %v3468_v25 = vrot.slane %v3440_v10, %v5972_v33 }
 0x2e6   :  { %v3436_v57 = vcombine.low %v3428_v44, %v3435_v47  ;;  %v3469_v9 = vcombine.low %v3447_v27, %v3454_v8  ;;  %v2171_v26 = vrot.slane %v1521_v29, %v5952_v38  ;;  %v2175_v28 = vrot.slane %v1521_v29, %v5955_v20 }
 0x2e7   :  { %v2179_v31 = vrot.slane %v1521_v29, %v5958_v59  ;;  %v2183_v4 = vrot.slane %v1521_v29, %v5961_v19  ;;  %v2187_v45 = vrot.slane %v1521_v29, %v5964_v16  ;;  %v1523_v12 = vpop.xlane.xlu1 %1522  ;;  %v3470_v60 = vcombine.low %v3461_v56, %v3468_v25 }
 0x2e8   :  { %4221 = vperm.xlu0 %4651, %v3436_v57   ;;  %v3477_v41 = vrot.slane %v3469_v9, %v5972_v33  ;;  %v3486_v1 = vcombine.low %v2159_v36, %v2163_v62  ;;  %v3487_v54 = vcombine.low %v2167_v0, %v2171_v26  ;;  %v2191_v40 = vrot.slane %v1523_v12, %v5124_v51 }
 0x2e9   :  { %v3488_v13 = vcombine.low %v2175_v28, %v2179_v31  ;;  %v3489_v21 = vcombine.low %v2183_v4, %v2187_v45  ;;  %v2195_v52 = vrot.slane %v1523_v12, %v5130_v53  ;;  %v3484_v14 = vrot.slane %v3470_v60, %v5972_v33 }
 0x2ea   :  { %v3496_v2 = vrot.slane %v3486_v1, %v5972_v33  ;;  %v3503_v24 = vrot.slane %v3487_v54, %v5972_v33  ;;  %v2199_v39 = vrot.slane %v1523_v12, %v5949_v61  ;;  %v2203_v34 = vrot.slane %v1523_v12, %v5952_v38 }
 0x2eb   :  { %v3510_v11 = vrot.slane %v3488_v13, %v5972_v33  ;;  %v3517_v5 = vrot.slane %v3489_v21, %v5972_v33  ;;  %v2207_v22 = vrot.slane %v1523_v12, %v5955_v20  ;;  %v3485_v3 = vcombine.low %v3477_v41, %v3484_v14 }
 0x2ec   :  { %v3518_v42 = vcombine.low %v3496_v2, %v3503_v24  ;;  %v2211_v7 = vrot.slane %v1523_v12, %v5958_v59  ;;  %v2215_v37 = vrot.slane %v1523_v12, %v5961_v19  ;;  %v2219_v63 = vrot.slane %v1523_v12, %v5964_v16 }
 0x2ed   :  { %v3519_v35 = vcombine.low %v3510_v11, %v3517_v5  ;;  %v3535_v58 = vcombine.low %v2191_v40, %v2195_v52  ;;  %v3536_v17 = vcombine.low %v2199_v39, %v2203_v34  ;;  %4224 = vperm.xlu1 %4652, %v3485_v3   ;;  %v6265_v46 = vcombine.low %v3330_v15, %v3337_v48 }
 0x2ee   :  { %v3526_v55 = vrot.slane %v3518_v42, %v5972_v33  ;;  %v3537_v44 = vcombine.low %v2207_v22, %v2211_v7  ;;  %v3356_v29 = vrot.slane %v6199_v43, %v5972_v33  ;;  %v1525_v47 = vpop.xlane.xlu0 %1524  ;;  %v3538_v27 = vcombine.low %v2215_v37, %v2219_v63 }
 0x2ef   :  { %v3533_v10 = vrot.slane %v3519_v35, %v5972_v33  ;;  %v3545_v8 = vrot.slane %v3535_v58, %v5972_v33  ;;  %v3552_v56 = vrot.slane %v3536_v17, %v5972_v33  ;;  %v2223_v62 = vrot.slane %v1525_v47, %v5124_v51 }
 0x2f0   :  { %v3559_v36 = vrot.slane %v3537_v44, %v5972_v33  ;;  %v2227_v0 = vrot.slane %v1525_v47, %v5130_v53  ;;  %v2231_v32 = vrot.slane %v1525_v47, %v5949_v61  ;;  %v3566_v48 = vrot.slane %v3538_v27, %v5972_v33 }
 0x2f1   :  { %v3534_v15 = vcombine.low %v3526_v55, %v3533_v10  ;;  %v3567_v57 = vcombine.low %v3545_v8, %v3552_v56  ;;  %v2235_v25 = vrot.slane %v1525_v47, %v5952_v38  ;;  %v2239_v9 = vrot.slane %v1525_v47, %v5955_v20 }
 0x2f2   :  { %v2243_v26 = vrot.slane %v1525_v47, %v5958_v59  ;;  %v2247_v28 = vrot.slane %v1525_v47, %v5961_v19  ;;  %v2251_v31 = vrot.slane %v1525_v47, %v5964_v16  ;;  %v1527_v4 = vpop.xlane.xlu1 %1526  ;;  %v3568_v45 = vcombine.low %v3559_v36, %v3566_v48 }
 0x2f3   :  { %4227 = vperm.xlu0 %4651, %v3534_v15   ;;  %v3575_v12 = vrot.slane %v3567_v57, %v5972_v33  ;;  %v3584_v60 = vcombine.low %v2223_v62, %v2227_v0  ;;  %v3585_v41 = vcombine.low %v2231_v32, %v2235_v25  ;;  %v2255_v13 = vrot.slane %v1527_v4, %v5124_v51 }
 0x2f4   :  { %v3586_v1 = vcombine.low %v2239_v9, %v2243_v26  ;;  %v3587_v54 = vcombine.low %v2247_v28, %v2251_v31  ;;  %v2259_v21 = vrot.slane %v1527_v4, %v5130_v53  ;;  %v3582_v40 = vrot.slane %v3568_v45, %v5972_v33 }
 0x2f5   :  { %v3594_v52 = vrot.slane %v3584_v60, %v5972_v33  ;;  %v3601_v14 = vrot.slane %v3585_v41, %v5972_v33  ;;  %v2263_v2 = vrot.slane %v1527_v4, %v5949_v61  ;;  %v2267_v11 = vrot.slane %v1527_v4, %v5952_v38 }
 0x2f6   :  { %v3608_v24 = vrot.slane %v3586_v1, %v5972_v33  ;;  %v3615_v39 = vrot.slane %v3587_v54, %v5972_v33  ;;  %v2271_v5 = vrot.slane %v1527_v4, %v5955_v20  ;;  %v1529_v34 = vpop.xlane.xlu0 %1528  ;;  %v3583_v22 = vcombine.low %v3575_v12, %v3582_v40 }
 0x2f7   :  { %v3616_v3 = vcombine.low %v3594_v52, %v3601_v14  ;;  %v2275_v42 = vrot.slane %v1527_v4, %v5958_v59  ;;  %v2279_v7 = vrot.slane %v1527_v4, %v5961_v19  ;;  %v2283_v35 = vrot.slane %v1527_v4, %v5964_v16 }
 0x2f8   :  { %v3617_v37 = vcombine.low %v3608_v24, %v3615_v39  ;;  %v3633_v63 = vcombine.low %v2255_v13, %v2259_v21  ;;  %v3634_v58 = vcombine.low %v2263_v2, %v2267_v11  ;;  %4230 = vperm.xlu1 %4652, %v3583_v22   ;;  %v2287_v44 = vrot.slane %v1529_v34, %v5124_v51 }
 0x2f9   :  { %v3624_v17 = vrot.slane %v3616_v3, %v5972_v33  ;;  %v3635_v55 = vcombine.low %v2271_v5, %v2275_v42  ;;  %v2291_v47 = vrot.slane %v1529_v34, %v5130_v53  ;;  %v3636_v27 = vcombine.low %v2279_v7, %v2283_v35 }
 0x2fa   :  { %v3631_v10 = vrot.slane %v3617_v37, %v5972_v33  ;;  %v3643_v8 = vrot.slane %v3633_v63, %v5972_v33  ;;  %v3650_v56 = vrot.slane %v3634_v58, %v5972_v33  ;;  %v1531_v36 = vpop.xlane.xlu1 %1530  ;;  %v2295_v0 = vrot.slane %v1529_v34, %v5949_v61 }
 0x2fb   :  { %v3657_v62 = vrot.slane %v3635_v55, %v5972_v33  ;;  %v2299_v32 = vrot.slane %v1529_v34, %v5952_v38  ;;  %v2303_v15 = vrot.slane %v1529_v34, %v5955_v20  ;;  %v3664_v57 = vrot.slane %v3636_v27, %v5972_v33 }
 0x2fc   :  { %v3632_v48 = vcombine.low %v3624_v17, %v3631_v10  ;;  %v3665_v25 = vcombine.low %v3643_v8, %v3650_v56  ;;  %v2307_v9 = vrot.slane %v1529_v34, %v5958_v59  ;;  %v2311_v26 = vrot.slane %v1529_v34, %v5961_v19 }
 0x2fd   :  { %v2315_v28 = vrot.slane %v1529_v34, %v5964_v16  ;;  %v3682_v31 = vcombine.low %v2287_v44, %v2291_v47  ;;  %v3683_v4 = vcombine.low %v2295_v0, %v2299_v32  ;;  %v3666_v45 = vcombine.low %v3657_v62, %v3664_v57 }
 0x2fe   :  { %4233 = vperm.xlu0 %4651, %v3632_v48   ;;  %v3673_v12 = vrot.slane %v3665_v25, %v5972_v33  ;;  %v3684_v60 = vcombine.low %v2303_v15, %v2307_v9  ;;  %v2319_v41 = vrot.slane %v1531_v36, %v5124_v51  ;;  %v2323_v21 = vrot.slane %v1531_v36, %v5130_v53  ;;  %v1533_v24 = vpop.xlane.xlu0 %1532 }
 0x2ff   :  { %v3685_v1 = vcombine.low %v2311_v26, %v2315_v28  ;;  %v3692_v54 = vrot.slane %v3682_v31, %v5972_v33  ;;  %v3699_v13 = vrot.slane %v3683_v4, %v5972_v33  ;;  %v3680_v40 = vrot.slane %v3666_v45, %v5972_v33 }
 0x300   :  { %v3706_v52 = vrot.slane %v3684_v60, %v5972_v33  ;;  %v2327_v14 = vrot.slane %v1531_v36, %v5949_v61  ;;  %v2331_v2 = vrot.slane %v1531_v36, %v5952_v38  ;;  %v2335_v5 = vrot.slane %v1531_v36, %v5955_v20 }
 0x301   :  { %v3713_v39 = vrot.slane %v3685_v1, %v5972_v33  ;;  %v3714_v11 = vcombine.low %v3692_v54, %v3699_v13  ;;  %v2339_v34 = vrot.slane %v1531_v36, %v5958_v59  ;;  %v3681_v22 = vcombine.low %v3673_v12, %v3680_v40 }
 0x302   :  { %v2343_v3 = vrot.slane %v1531_v36, %v5961_v19  ;;  %v2347_v42 = vrot.slane %v1531_v36, %v5964_v16  ;;  %v3731_v7 = vcombine.low %v2319_v41, %v2323_v21  ;;  %v3732_v63 = vcombine.low %v2327_v14, %v2331_v2  ;;  %v1535_v36 = vpop.xlane.xlu1 %1534 }
 0x303   :  { %v3715_v37 = vcombine.low %v3706_v52, %v3713_v39  ;;  %v3722_v35 = vrot.slane %v3714_v11, %v5972_v33  ;;  %v3733_v58 = vcombine.low %v2335_v5, %v2339_v34  ;;  %4236 = vperm.xlu1 %4652, %v3681_v22   ;;  %v2351_v44 = vrot.slane %v1533_v24, %v5124_v51 }
 0x304   :  { %v3734_v17 = vcombine.low %v2343_v3, %v2347_v42  ;;  %v3741_v55 = vrot.slane %v3731_v7, %v5972_v33  ;;  %v2355_v47 = vrot.slane %v1533_v24, %v5130_v53  ;;  %v3748_v27 = vrot.slane %v3732_v63, %v5972_v33 }
 0x305   :  { %v3729_v10 = vrot.slane %v3715_v37, %v5972_v33  ;;  %v3755_v8 = vrot.slane %v3733_v58, %v5972_v33  ;;  %v2359_v56 = vrot.slane %v1533_v24, %v5949_v61  ;;  %v2363_v0 = vrot.slane %v1533_v24, %v5952_v38 }
 0x306   :  { %v3762_v62 = vrot.slane %v3734_v17, %v5972_v33  ;;  %v2367_v32 = vrot.slane %v1533_v24, %v5955_v20  ;;  %v2371_v15 = vrot.slane %v1533_v24, %v5958_v59  ;;  %v3763_v57 = vcombine.low %v3741_v55, %v3748_v27  ;;  %v1537_v40 = vpop.xlane.xlu0 %1536 }
 0x307   :  { %v3730_v48 = vcombine.low %v3722_v35, %v3729_v10  ;;  %v2375_v25 = vrot.slane %v1533_v24, %v5961_v19  ;;  %v2379_v9 = vrot.slane %v1533_v24, %v5964_v16  ;;  %v3780_v28 = vcombine.low %v2351_v44, %v2355_v47 }
 0x308   :  { %v3764_v26 = vcombine.low %v3755_v8, %v3762_v62  ;;  %v3781_v31 = vcombine.low %v2359_v56, %v2363_v0  ;;  %v3782_v4 = vcombine.low %v2367_v32, %v2371_v15  ;;  %v3771_v45 = vrot.slane %v3763_v57, %v5972_v33 }
 0x309   :  { %4239 = vperm.xlu0 %4651, %v3730_v48   ;;  %v3783_v12 = vcombine.low %v2375_v25, %v2379_v9  ;;  %v2383_v60 = vrot.slane %v1535_v36, %v5124_v51  ;;  %v2387_v41 = vrot.slane %v1535_v36, %v5130_v53  ;;  %v3790_v54 = vrot.slane %v3780_v28, %v5972_v33 }
 0x30a   :  { %v3778_v1 = vrot.slane %v3764_v26, %v5972_v33  ;;  %v3797_v13 = vrot.slane %v3781_v31, %v5972_v33  ;;  %v3804_v21 = vrot.slane %v3782_v4, %v5972_v33  ;;  %v2391_v14 = vrot.slane %v1535_v36, %v5949_v61  ;;  %v1539_v15 = vpop.xlane.xlu1 %1538 }
 0x30b   :  { %v3811_v52 = vrot.slane %v3783_v12, %v5972_v33  ;;  %v2395_v2 = vrot.slane %v1535_v36, %v5952_v38  ;;  %v2399_v24 = vrot.slane %v1535_v36, %v5955_v20  ;;  %v2403_v5 = vrot.slane %v1535_v36, %v5958_v59 }
 0x30c   :  { %v3779_v39 = vcombine.low %v3771_v45, %v3778_v1  ;;  %v3812_v11 = vcombine.low %v3790_v54, %v3797_v13  ;;  %v2407_v34 = vrot.slane %v1535_v36, %v5961_v19  ;;  %v2411_v3 = vrot.slane %v1535_v36, %v5964_v16 }
 0x30d   :  { %v3813_v22 = vcombine.low %v3804_v21, %v3811_v52  ;;  %v3829_v42 = vcombine.low %v2383_v60, %v2387_v41  ;;  %v3830_v7 = vcombine.low %v2391_v14, %v2395_v2  ;;  %v3831_v35 = vcombine.low %v2399_v24, %v2403_v5 }
 0x30e   :  { %4242 = vperm.xlu1 %4652, %v3779_v39   ;;  %v3820_v37 = vrot.slane %v3812_v11, %v5972_v33  ;;  %v2415_v63 = vrot.slane %v1537_v40, %v5124_v51  ;;  %v2419_v58 = vrot.slane %v1537_v40, %v5130_v53  ;;  %v3832_v55 = vcombine.low %v2407_v34, %v2411_v3 }
 0x30f   :  { %v3827_v17 = vrot.slane %v3813_v22, %v5972_v33  ;;  %v3839_v44 = vrot.slane %v3829_v42, %v5972_v33  ;;  %v3846_v47 = vrot.slane %v3830_v7, %v5972_v33  ;;  %v3853_v10 = vrot.slane %v3831_v35, %v5972_v33 }
 0x310   :  { %v2423_v27 = vrot.slane %v1537_v40, %v5949_v61  ;;  %v2427_v8 = vrot.slane %v1537_v40, %v5952_v38  ;;  %v2431_v56 = vrot.slane %v1537_v40, %v5955_v20  ;;  %v3860_v62 = vrot.slane %v3832_v55, %v5972_v33 }
 0x311   :  { %v3828_v36 = vcombine.low %v3820_v37, %v3827_v17  ;;  %v3861_v0 = vcombine.low %v3839_v44, %v3846_v47  ;;  %v2435_v32 = vrot.slane %v1537_v40, %v5958_v59  ;;  %v2439_v48 = vrot.slane %v1537_v40, %v5961_v19 }
 0x312   :  { %v2443_v57 = vrot.slane %v1537_v40, %v5964_v16  ;;  %v3878_v25 = vcombine.low %v2415_v63, %v2419_v58  ;;  %v3879_v9 = vcombine.low %v2423_v27, %v2427_v8  ;;  %v3862_v26 = vcombine.low %v3853_v10, %v3860_v62 }
 0x313   :  { %4245 = vperm.xlu0 %4651, %v3828_v36   ;;  %v3869_v28 = vrot.slane %v3861_v0, %v5972_v33  ;;  %v3880_v31 = vcombine.low %v2431_v56, %v2435_v32  ;;  %v3363_v4 = vrot.slane %v6213_v6, %v5972_v33  ;;  %v3370_v41 = vrot.slane %v6215_v18, %v5972_v33  ;;  %v1541_v18 = vpop.xlane.xlu0 %1540  ;;  %v1543_v44 = vpop.xlane.xlu1 %1542 }
 0x314   :  { %v3881_v45 = vcombine.low %v2439_v48, %v2443_v57  ;;  %v3888_v12 = vrot.slane %v3878_v25, %v5972_v33  ;;  %v3895_v60 = vrot.slane %v3879_v9, %v5972_v33  ;;  %v3876_v1 = vrot.slane %v3862_v26, %v5972_v33 }
 0x315   :  { %v3902_v54 = vrot.slane %v3880_v31, %v5972_v33  ;;  %v3371_v13 = vcombine.low %v3349_v30, %v3356_v29  ;;  %v2447_v6 = vrot.slane %v1539_v15, %v5124_v51  ;;  %v3372_v52 = vcombine.low %v3363_v4, %v3370_v41 }
 0x316   :  { %v3909_v21 = vrot.slane %v3881_v45, %v5972_v33  ;;  %v3910_v40 = vcombine.low %v3888_v12, %v3895_v60  ;;  %v2451_v14 = vrot.slane %v1539_v15, %v5130_v53  ;;  %v3877_v2 = vcombine.low %v3869_v28, %v3876_v1 }
 0x317   :  { %v3379_v24 = vrot.slane %v3371_v13, %v5972_v33  ;;  %v2455_v39 = vrot.slane %v1539_v15, %v5949_v61  ;;  %v2459_v43 = vrot.slane %v1539_v15, %v5952_v38  ;;  %v3386_v30 = vrot.slane %v3372_v52, %v5972_v33 }
 0x318   :  { %v3911_v11 = vcombine.low %v3902_v54, %v3909_v21  ;;  %v3918_v23 = vrot.slane %v3910_v40, %v5972_v33  ;;  %v2463_v29 = vrot.slane %v1539_v15, %v5955_v20  ;;  %4248 = vperm.xlu1 %4652, %v3877_v2   ;;  %v2467_v5 = vrot.slane %v1539_v15, %v5958_v59  ;;  %v1545_v54 = vpop.xlane.xlu0 %1544 }
 0x319   :  { %v2471_v34 = vrot.slane %v1539_v15, %v5961_v19  ;;  %v2475_v22 = vrot.slane %v1539_v15, %v5964_v16  ;;  %v3927_v3 = vcombine.low %v2447_v6, %v2451_v14  ;;  %v3387_v7 = vcombine.low %v3379_v24, %v3386_v30 }
 0x31a   :  { %v3925_v42 = vrot.slane %v3911_v11, %v5972_v33  ;;  %v3928_v37 = vcombine.low %v2455_v39, %v2459_v43  ;;  %v2479_v35 = vrot.slane %v1541_v18, %v5124_v51  ;;  %v3929_v63 = vcombine.low %v2463_v29, %v2467_v5 }
 0x31b   :  { %v3930_v58 = vcombine.low %v2471_v34, %v2475_v22  ;;  %v3937_v17 = vrot.slane %v3927_v3, %v5972_v33  ;;  %v2483_v55 = vrot.slane %v1541_v18, %v5130_v53  ;;  %v2487_v27 = vrot.slane %v1541_v18, %v5949_v61 }
 0x31c   :  { %v3926_v47 = vcombine.low %v3918_v23, %v3925_v42  ;;  %v3944_v10 = vrot.slane %v3928_v37, %v5972_v33  ;;  %v2491_v8 = vrot.slane %v1541_v18, %v5952_v38  ;;  %4215 = vperm.xlu1 %4652, %v6265_v46   ;;  %v3951_v56 = vrot.slane %v3929_v63, %v5972_v33 }
 0x31d   :  { %v3958_v36 = vrot.slane %v3930_v58, %v5972_v33  ;;  %v2495_v62 = vrot.slane %v1541_v18, %v5955_v20  ;;  %v2499_v0 = vrot.slane %v1541_v18, %v5958_v59  ;;  %v2503_v15 = vrot.slane %v1541_v18, %v5961_v19 }
 0x31e   :  { %4251 = vperm.xlu0 %4651, %v3926_v47   ;;  %v3959_v32 = vcombine.low %v3937_v17, %v3944_v10  ;;  %v2507_v48 = vrot.slane %v1541_v18, %v5964_v16  ;;  %v3976_v57 = vcombine.low %v2479_v35, %v2483_v55  ;;  %v3977_v9 = vcombine.low %v2487_v27, %v2491_v8 }
 0x31f   :  { %v3960_v25 = vcombine.low %v3951_v56, %v3958_v36  ;;  %v3978_v26 = vcombine.low %v2495_v62, %v2499_v0  ;;  %v2511_v46 = vrot.slane %v1543_v44, %v5124_v51  ;;  %v2515_v45 = vrot.slane %v1543_v44, %v5130_v53 }
 0x320   :  { %v3967_v28 = vrot.slane %v3959_v32, %v5972_v33  ;;  %v3979_v31 = vcombine.low %v2503_v15, %v2507_v48  ;;  %v3986_v4 = vrot.slane %v3976_v57, %v5972_v33  ;;  %4218 = vperm.xlu1 %4652, %v3387_v7   ;;  %v3993_v60 = vrot.slane %v3977_v9, %v5972_v33  ;;  %v1547_v7 = vpop.xlane.xlu1 %1546 }
 0x321   :  { %v3974_v12 = vrot.slane %v3960_v25, %v5972_v33  ;;  %v4000_v41 = vrot.slane %v3978_v26, %v5972_v33  ;;  %v2519_v1 = vrot.slane %v1543_v44, %v5949_v61  ;;  %v2523_v6 = vrot.slane %v1543_v44, %v5952_v38 }
 0x322   :  { %v4007_v13 = vrot.slane %v3979_v31, %v5972_v33  ;;  %v2527_v21 = vrot.slane %v1543_v44, %v5955_v20  ;;  %v2531_v40 = vrot.slane %v1543_v44, %v5958_v59  ;;  %v4008_v14 = vcombine.low %v3986_v4, %v3993_v60 }
 0x323   :  { %v3975_v52 = vcombine.low %v3967_v28, %v3974_v12  ;;  %v2535_v18 = vrot.slane %v1543_v44, %v5961_v19  ;;  %v2539_v2 = vrot.slane %v1543_v44, %v5964_v16  ;;  %v4025_v39 = vcombine.low %v2511_v46, %v2515_v45 }
 0x324   :  { %v4009_v24 = vcombine.low %v4000_v41, %v4007_v13  ;;  %v4026_v43 = vcombine.low %v2519_v1, %v2523_v6  ;;  %v4027_v11 = vcombine.low %v2527_v21, %v2531_v40  ;;  %v4016_v23 = vrot.slane %v4008_v14, %v5972_v33 }
 0x325   :  { %4254 = vperm.xlu0 %4651, %v3975_v52   ;;  %v4028_v30 = vcombine.low %v2535_v18, %v2539_v2  ;;  %v2543_v29 = vrot.slane %v1545_v54, %v5124_v51  ;;  %v2547_v5 = vrot.slane %v1545_v54, %v5130_v53  ;;  %v4035_v22 = vrot.slane %v4025_v39, %v5972_v33  ;;  %v4177_v2 = vpop.permute.xlu1 %4176 }
 0x326   :  { %v4023_v34 = vrot.slane %v4009_v24, %v5972_v33  ;;  %v4042_v3 = vrot.slane %v4026_v43, %v5972_v33  ;;  %v4049_v42 = vrot.slane %v4027_v11, %v5972_v33  ;;  %v2551_v35 = vrot.slane %v1545_v54, %v5949_v61 }
 0x327   :  { %v4056_v37 = vrot.slane %v4028_v30, %v5972_v33  ;;  %v2555_v63 = vrot.slane %v1545_v54, %v5952_v38  ;;  %v2559_v58 = vrot.slane %v1545_v54, %v5955_v20  ;;  %v2563_v44 = vrot.slane %v1545_v54, %v5958_v59 }
 0x328   :  { %v4024_v17 = vcombine.low %v4016_v23, %v4023_v34  ;;  %v4057_v55 = vcombine.low %v4035_v22, %v4042_v3  ;;  %v2567_v47 = vrot.slane %v1545_v54, %v5961_v19  ;;  %v2571_v27 = vrot.slane %v1545_v54, %v5964_v16 }
 0x329   :  { %v4058_v10 = vcombine.low %v4049_v42, %v4056_v37  ;;  %v4074_v8 = vcombine.low %v2543_v29, %v2547_v5  ;;  %v4075_v56 = vcombine.low %v2551_v35, %v2555_v63  ;;  %v4076_v62 = vcombine.low %v2559_v58, %v2563_v44  ;;  %v4180_v24 = vpop.permute.xlu1 %4179  ;;  %v4174_v5 = vpop.permute.xlu0 %4173 }
 0x32a   :  { %4257 = vperm.xlu0 %4651, %v4024_v17   ;;  %v4065_v36 = vrot.slane %v4057_v55, %v5972_v33  ;;  %v2575_v0 = vrot.slane %v1547_v7, %v5124_v51  ;;  %v4077_v15 = vcombine.low %v2567_v47, %v2571_v27  ;;  %v2579_v9 = vrot.slane %v1547_v7, %v5130_v53 }
 0x32b   :  { %v4072_v32 = vrot.slane %v4058_v10, %v5972_v33  ;;  %v4084_v48 = vrot.slane %v4074_v8, %v5972_v33  ;;  %v4091_v57 = vrot.slane %v4075_v56, %v5972_v33  ;;  %v4098_v25 = vrot.slane %v4076_v62, %v5972_v33 }
 0x32c   :  { %v2583_v26 = vrot.slane %v1547_v7, %v5949_v61  ;;  %v4105_v28 = vrot.slane %v4077_v15, %v5972_v33  ;;  %v2587_v4 = vrot.slane %v1547_v7, %v5952_v38  ;;  %v2591_v51 = vrot.slane %v1547_v7, %v5955_v20 }
 0x32d   :  { %v4073_v46 = vcombine.low %v4065_v36, %v4072_v32  ;;  %v4106_v31 = vcombine.low %v4084_v48, %v4091_v57  ;;  %v2595_v45 = vrot.slane %v1547_v7, %v5958_v59  ;;  %v2599_v12 = vrot.slane %v1547_v7, %v5961_v19  ;;  %v4183_v39 = vpop.permute.xlu1 %4182 }
 0x32e   :  { %v2603_v60 = vrot.slane %v1547_v7, %v5964_v16  ;;  %v4107_v41 = vcombine.low %v4098_v25, %v4105_v28  ;;  %v4123_v1 = vcombine.low %v2575_v0, %v2579_v9  ;;  %v4124_v61 = vcombine.low %v2583_v26, %v2587_v4 }
 0x32f   :  { %4260 = vperm.xlu0 %4651, %v4073_v46   ;;  %v4114_v53 = vrot.slane %v4106_v31, %v5972_v33  ;;  %v4125_v54 = vcombine.low %v2591_v51, %v2595_v45  ;;  %v6486_v17 = vand.u32 127, %v98_v49 }
 0x330   :  { %v4126_v13 = vcombine.low %v2599_v12, %v2603_v60  ;;  %v4121_v6 = vrot.slane %v4107_v41, %v5972_v33  ;;  %v4133_v38 = vrot.slane %v4123_v1, %v5972_v33  ;;  %v4140_v20 = vrot.slane %v4124_v61, %v5972_v33 }
 0x331   :  { %v4147_v59 = vrot.slane %v4125_v54, %v5972_v33  ;;  %v6457_v43 = vpop.permute.xlu1 %4185  ;;  %v4274_v47 = vadd.s32 4294967288, %v6486_v17  ;;  %v4281_v10 = vadd.s32 4294967280, %v6486_v17  ;;  %v4288_v27 = vadd.s32 4294967272, %v6486_v17 }
 0x332   :  { %v4154_v19 = vrot.slane %v4126_v13, %v5972_v33  ;;  %v4122_v21 = vcombine.low %v4114_v53, %v4121_v6  ;;  %v4155_v16 = vcombine.low %v4133_v38, %v4140_v20  ;;  %v4295_v56 = vadd.s32 4294967264, %v6486_v17 }
 0x333   :  { %v4277_v62 = vsub.s32 %v4274_v47, %v5121_v50  ;;  %v4302_v0 = vadd.s32 4294967256, %v6486_v17  ;;  %v4272_v32 = vsub.s32 %v6486_v17, %v5121_v50  ;;  %v4284_v15 = vsub.s32 %v4281_v10, %v5121_v50 }
 0x334   :  { %v4156_v40 = vcombine.low %v4147_v59, %v4154_v19  ;;  %4263 = vperm.xlu0 %4651, %v4122_v21   ;;  %v4163_v52 = vrot.slane %v4155_v16, %v5972_v33  ;;  %v4309_v48 = vadd.s32 4294967248, %v6486_v17  ;;  %v6507_v57 = vsub.s32 %v4288_v27, %v5121_v50 }
 0x335   :  { %v6459_v11 = vpop.permute.xlu1 %4188  ;;  %v4316_v25 = vadd.s32 4294967240, %v6486_v17  ;;  %v6513_v26 = vsub.s32 %v4295_v56, %v5121_v50  ;;  %v4278_v46 = vrot.slane %v4177_v2, %v4277_v62  ;;  %v6516_v28 = vsub.s32 %v4302_v0, %v5121_v50 }
 0x336   :  { %v4170_v14 = vrot.slane %v4156_v40, %v5972_v33  ;;  %v4273_v31 = vrot.slane %v4174_v5, %v4272_v32  ;;  %v4285_v4 = vrot.slane %v4180_v24, %v4284_v15  ;;  %v6519_v51 = vsub.s32 %v4309_v48, %v5121_v50 }
 0x337   :  { %v4292_v12 = vrot.slane %v4183_v39, %v6507_v57  ;;  %v6525_v60 = vsub.s32 %v4316_v25, %v5121_v50  ;;  %v4323_v41 = vadd.s32 4294967232, %v6486_v17  ;;  %v4299_v1 = vrot.slane %v6457_v43, %v6513_v26 }
 0x338   :  { %v4171_v18 = vcombine.low %v4163_v52, %v4170_v14  ;;  %v4280_v61 = vsel %vm4279_vm0, %v4278_v46, %v4273_v31  ;;  %v4306_v54 = vrot.slane %v6459_v11, %v6516_v28  ;;  %v4330_v38 = vadd.s32 4294967224, %v6486_v17 }
 0x339   :  { %v6461_v23 = vpop.permute.xlu1 %4191  ;;  %v4287_v13 = vsel %vm4286_vm1, %v4285_v4, %v4280_v61  ;;  %v4326_v19 = vsub.s32 %v4323_v41, %v5121_v50  ;;  %v4337_v52 = vadd.s32 4294967216, %v6486_v17  ;;  %v4344_v2 = vadd.s32 4294967208, %v6486_v17 }
 0x33a   :  { %4266 = vperm.xlu0 %4651, %v4171_v18   ;;  %v4313_v6 = vrot.slane %v6461_v23, %v6519_v51  ;;  %v4294_v20 = vsel %vm4293_vm2, %v4292_v12, %v4287_v13  ;;  %v4333_v43 = vsub.s32 %v4330_v38, %v5121_v50  ;;  %v4358_v10 = vadd.s32 4294967192, %v6486_v17 }
 0x33b   :  { %v4301_v40 = vsel %vm4300_vm3, %v4299_v1, %v4294_v20  ;;  %v4340_v47 = vsub.s32 %v4337_v52, %v5121_v50  ;;  %v4347_v56 = vsub.s32 %v4344_v2, %v5121_v50  ;;  %v4365_v0 = vadd.s32 4294967184, %v6486_v17 }
 0x33c   :  { %v4308_v18 = vsel %vm4307_vm4, %v4306_v54, %v4301_v40  ;;  %v4372_v48 = vadd.s32 4294967176, %v6486_v17 }
 0x33d   :  { %v6463_v30 = vpop.permute.xlu1 %4194  ;;  %v4315_v39 = vsel %vm4314_vm5, %v4313_v6, %v4308_v18 }
 0x33e   :  { %v4320_v59 = vrot.slane %v6463_v30, %v6525_v60 }
 0x340   :  { %v4322_v30 = vsel %vm4321_vm6, %v4320_v59, %v4315_v39 }
 0x341   :  { %v6465_v29 = vpop.permute.xlu1 %4197  ;;  %v6469_v22 = vpop.permute.xlu0 %4200 }
 0x342   :  { %v4327_v5 = vrot.slane %v6465_v29, %v4326_v19 }
 0x346   :  { %v6467_v34 = vpop.permute.xlu1 %4203 }
 0x347   :  { %v4341_v31 = vrot.slane %v6467_v34, %v4340_v47 }
 0x34c   :  { %v6471_v3 = vpop.permute.xlu1 %4206 }
 0x34d   :  { %v4348_v12 = vrot.slane %v6471_v3, %v4347_v56 }
 0x351   :  { %v6477_v37 = vpop.permute.xlu1 %4209 }
 0x356   :  { %v6481_v63 = vpop.permute.xlu1 %4212 }
 0x363   :  { %v6473_v42 = vpop.permute.xlu0 %4221 }
 0x364   :  { %v4382_v11 = vrot.slane %v6473_v42, %v4272_v32 }
 0x368   :  { %v6488_v55 = vpop.permute.xlu1 %4224 }
 0x369   :  { %v4386_v14 = vrot.slane %v6488_v55, %v4277_v62  ;;  %v4351_v55 = vadd.s32 4294967200, %v6486_v17  ;;  %v4368_v17 = vsub.s32 %v4365_v0, %v5121_v50 }
 0x36b   :  { %v4387_v27 = vsel %vm4279_vm0, %v4386_v14, %v4382_v11 }
 0x36e   :  { %v6475_v7 = vpop.permute.xlu0 %4227 }
 0x36f   :  { %v4391_v24 = vrot.slane %v6475_v7, %v4284_v15 }
 0x371   :  { %v4392_v29 = vsel %vm4286_vm1, %v4391_v24, %v4387_v27 }
 0x373   :  { %v6495_v8 = vpop.permute.xlu1 %4230 }
 0x374   :  { %v4396_v23 = vrot.slane %v6495_v8, %v6507_v57  ;;  %v4354_v57 = vsub.s32 %v4351_v55, %v5121_v50 }
 0x376   :  { %v4397_v32 = vsel %vm4293_vm2, %v4396_v23, %v4392_v29  ;;  %v4355_v1 = vrot.slane %v6477_v37, %v4354_v57 }
 0x379   :  { %v6479_v35 = vpop.permute.xlu0 %4233 }
 0x37a   :  { %v4401_v7 = vrot.slane %v6479_v35, %v6513_v26  ;;  %v4361_v26 = vsub.s32 %v4358_v10, %v5121_v50 }
 0x37c   :  { %v4402_v25 = vsel %vm4300_vm3, %v4401_v7, %v4397_v32  ;;  %v4362_v3 = vrot.slane %v6481_v63, %v4361_v26 }
 0x37e   :  { %v6510_v9 = vpop.permute.xlu1 %4236 }
 0x37f   :  { %v4406_v42 = vrot.slane %v6510_v9, %v6516_v28 }
 0x381   :  { %v4407_v46 = vsel %vm4307_vm4, %v4406_v42, %v4402_v25 }
 0x384   :  { %v6483_v58 = vpop.permute.xlu0 %4239 }
 0x385   :  { %v4411_v62 = vrot.slane %v6483_v58, %v6519_v51  ;;  %v4334_v58 = vrot.slane %v6469_v22, %v4333_v43 }
 0x387   :  { %v4412_v4 = vsel %vm4314_vm5, %v4411_v62, %v4407_v46 }
 0x389   :  { %v6528_v53 = vpop.permute.xlu1 %4242 }
 0x38a   :  { %v4416_v15 = vrot.slane %v6528_v53, %v6525_v60  ;;  %v4329_v53 = vsel %vm4328_vm7, %v4327_v5, %v4322_v30 }
 0x38c   :  { %v4417_v60 = vsel %vm4321_vm6, %v4416_v15, %v4412_v4 }
 0x38e   :  { %v6490_v44 = vpop.permute.xlu0 %4245 }
 0x38f   :  { %v4421_v9 = vrot.slane %v6490_v44, %v4326_v19  ;;  %v4375_v44 = vsub.s32 %v4372_v48, %v5121_v50 }
 0x391   :  { %v4422_v34 = vsel %vm4328_vm7, %v4421_v9, %v4417_v60 }
 0x393   :  { %v4249_v21 = vpop.permute.xlu1 %4248 }
 0x394   :  { %v4426_v28 = vrot.slane %v4249_v21, %v4333_v43 }
 0x396   :  { %v4427_v13 = vsel %vm4335_vm8, %v4426_v28, %v4422_v34 }
 0x397   :  { %v4216_v35 = vpop.permute.xlu1 %4215 }
 0x399   :  { %v6498_v36 = vpop.permute.xlu0 %4251 }
 0x39a   :  { %v4431_v51 = vrot.slane %v6498_v36, %v4340_v47  ;;  %v4336_v36 = vsel %vm4335_vm8, %v4334_v58, %v4329_v53 }
 0x39b   :  { %v4219_v61 = vpop.permute.xlu1 %4218  ;;  %v4343_v50 = vsel %vm4342_vm9, %v4341_v31, %v4336_v36 }
 0x39c   :  { %v4432_v38 = vsel %vm4342_vm9, %v4431_v51, %v4427_v13  ;;  %v4350_v37 = vsel %vm4349_vm10, %v4348_v12, %v4343_v50  ;;  %v4376_v59 = vrot.slane %v4219_v61, %v4375_v44 }
 0x39d   :  { %v4357_v21 = vsel %vm4356_vm11, %v4355_v1, %v4350_v37 }
 0x39e   :  { %v4364_v40 = vsel %vm4363_vm12, %v4362_v3, %v4357_v21 }
 0x3a0   :  { %v6521_v45 = vpop.permute.xlu0 %4254 }
 0x3a1   :  { %v4436_v22 = vrot.slane %v6521_v45, %v4347_v56  ;;  %v4369_v45 = vrot.slane %v4216_v35, %v4368_v17 }
 0x3a3   :  { %v4437_v19 = vsel %vm4349_vm10, %v4436_v22, %v4432_v38  ;;  %v4371_v18 = vsel %vm4370_vm13, %v4369_v45, %v4364_v40 }
 0x3a4   :  { %v4378_v24 = vsel %vm4377_vm14, %v4376_v59, %v4371_v18 }
 0x3a5   :  { %v6543_v16 = vpop.permute.xlu0 %4257 }
 0x3a6   :  { %v4441_v54 = vrot.slane %v6543_v16, %v4354_v57 }
 0x3a8   :  { %v4442_v63 = vsel %vm4356_vm11, %v4441_v54, %v4437_v19 }
 0x3aa   :  { %v4261_v8 = vpop.permute.xlu0 %4260 }
 0x3ab   :  { %v4446_v6 = vrot.slane %v4261_v8, %v4361_v26 }
 0x3ad   :  { %v4447_v52 = vsel %vm4363_vm12, %v4446_v6, %v4442_v63 }
 0x3af   :  { %v4264_v41 = vpop.permute.xlu0 %4263 }
 0x3b0   :  { %v4451_v20 = vrot.slane %v4264_v41, %v4368_v17 }
 0x3b2   :  { %v4452_v2 = vsel %vm4370_vm13, %v4451_v20, %v4447_v52 }
 0x3b5   :  { %v4267_v16 = vpop.permute.xlu0 %4266 }
 0x3b6   :  { %v4456_v14 = vrot.slane %v4267_v16, %v4375_v44 }
 0x3b8   :  { %v4457_v39 = vsel %vm4377_vm14, %v4456_v14, %v4452_v2 }
 0x3b9   :  { %v4458_v43 = vcombine.low %v4378_v24, %v4457_v39 }
 0x3bb   :  { %v4465_v11 = vrot.slane %v4458_v43, %v5972_v33 }
 0x3bd   :  { %v4472_v23 = vrot.slane %v4465_v11, %v5972_v33 }
 0x3bf   :  { %4478 = vst.msk [vmem:[%s6616_s6] sm:$0x3] %vm4476_vm15, %v4472_v23 }
 0x3c0   :  { %4483 = vsyncpa [#allocation3], 1 }
 0x3c1   :  { %4484 = vsyncpa [#allocation5], 1 }

</bundles_post_ra>
